<compile_context>
chip_gen: v5e
topology: v5e:2x2
jax: 0.10.0
libtpu: 0.0.40
codegen_flags: <defaults>
</compile_context>

<pallas_src>
import functools

import jax
import jax.numpy as jnp
from jax.experimental import pallas as pl
from jax.experimental.pallas import tpu as pltpu

VMEM = pltpu.MemorySpace.VMEM

# ---- hyper-params taken from the PyTorch module -----------------------------
AUTOENC = dict(input_dim=1024, encoding_dim=256)
NCF = dict(num_users=10000, num_items=1000, general_dim=8,
           hidden_units=[64, 32, 16], output_dim=1)
WIDE_DEEP = dict(wide_dim=100, deep_dim=64, hidden_units=[128, 64], output_dim=1)

# FLAGS stand-ins (small, self-consistent)
NUM_BERT_CLASSES = 4   # len(FLAGS.classes)
BERT_INPUT_DIM = 32    # FLAGS.bert_input_dim
NUM_LABELS = 3         # FLAGS.num_labels
BERT_HIDDEN = 64
VOCAB = 128
SEQ = 16
BATCH = 8


# =============================== fused Pallas kernel ==========================
def _dsc_rs_fused_kernel(
    # data
    wide_ref, deep_ref, ufeat_ref, ifeat_ref, text_ref,
    ids_ref, tt_ref, mask_ref, lab_ref,
    # wide & deep weights
    wd_wide_w_ref, wd_d1_w_ref, wd_d2_w_ref, wd_d3_w_ref,
    # NCF weights
    ncf_w1_ref, ncf_w2_ref, ncf_w3_ref, ncf_wout_ref,
    # autoencoder encoder
    ae_enc_w_ref, ae_enc_b_ref,
    # processing layer
    proc_w_ref,
    # bert stand-in
    word_emb_ref, type_emb_ref, cls_w_ref,
    # additional classifier (weight pre-split along its input axis)
    clf_w_log_ref, clf_w_proc_ref, clf_w_zd_ref,
    # packed biases
    bias_ref,
    # outputs
    loss_ref, clf_ref):
  f32 = jnp.float32
  B, S = ids_ref.shape
  V = word_emb_ref.shape[0]
  g = ufeat_ref.shape[1]

  # ---- unpack biases (single VMEM slab, one load) ----------------------------
  bp = bias_ref[...]                                       # (10, 128)
  d1 = wd_d1_w_ref.shape[1]
  d2 = wd_d2_w_ref.shape[1]
  n1 = ncf_w2_ref.shape[0]
  n2 = ncf_w3_ref.shape[0]
  n3 = ncf_wout_ref.shape[0]
  pdim = proc_w_ref.shape[1]
  ncls = cls_w_ref.shape[1]
  nlab = clf_w_log_ref.shape[1]
  wd_d1_b = bp[0:1, :d1]
  wd_d2_b = bp[1:2, :d2]
  ncf_l1_b = bp[2:3, :n1]
  ncf_l2_b = bp[3:4, :n2]
  ncf_l3_b = bp[4:5, :n3]
  proc_b = bp[5:6, :pdim]
  cls_b = bp[6:7, :ncls]
  clf_b = bp[7:8, :nlab]
  wd_out_b = bp[8:9, 0:1]                                  # wide_b + deep3_b folded
  ncf_out_b = bp[9:10, 0:1]

  # ---- Wide & Deep: C_p = wide(x_w) + deep_mlp(x_d) ---------------------------
  h = jnp.maximum(
      jnp.dot(deep_ref[...], wd_d1_w_ref[...], preferred_element_type=f32) + wd_d1_b, 0.0)
  h = jnp.maximum(
      jnp.dot(h, wd_d2_w_ref[...], preferred_element_type=f32) + wd_d2_b, 0.0)
  C_p = (jnp.dot(wide_ref[...], wd_wide_w_ref[...], preferred_element_type=f32)
         + jnp.dot(h, wd_d3_w_ref[...], preferred_element_type=f32)
         + wd_out_b)                                        # (B, 1)

  # ---- NCF MLP: first layer uses a split W1, so no activation concat ----------
  w1 = ncf_w1_ref[...]                                      # (2g, H1)
  h = jnp.maximum(
      jnp.dot(ufeat_ref[...], w1[0:g, :], preferred_element_type=f32)
      + jnp.dot(ifeat_ref[...], w1[g:2 * g, :], preferred_element_type=f32)
      + ncf_l1_b, 0.0)
  h = jnp.maximum(jnp.dot(h, ncf_w2_ref[...], preferred_element_type=f32) + ncf_l2_b, 0.0)
  h = jnp.maximum(jnp.dot(h, ncf_w3_ref[...], preferred_element_type=f32) + ncf_l3_b, 0.0)
  C_u = jnp.dot(h, ncf_wout_ref[...], preferred_element_type=f32) + ncf_out_b   # (B, 1)

  # ---- TextAutoencoder: encoder only (reconstruction is unused downstream) ----
  Z_d = jnp.maximum(
      jnp.dot(text_ref[...], ae_enc_w_ref[...], preferred_element_type=f32)
      + ae_enc_b_ref[...], 0.0)                             # (B, 256)

  # ---- processing_layer on cat([C_p, C_u]) via split weight (no concat) -------
  pw = proc_w_ref[...]                                      # (2, bert_input_dim)
  proc_out = C_p * pw[0:1, :] + C_u * pw[1:2, :] + proc_b   # (B, 32)

  # ---- documentLevelBert stand-in ---------------------------------------------
  # word-embedding gather + masked sum pooling fused as: masked one-hot vocab
  # histogram (B,V) @ word_emb (V,H)  -> one MXU matmul.  Masking is done in the
  # int domain (masked-out ids pushed out of vocab range) so the one-hot compare
  # already yields zero rows — no f32 broadcast multiply on the (B,S,V) one-hot.
  mask = mask_ref[...].astype(f32)                          # (B, S)
  tt = tt_ref[...].astype(f32)                              # (B, S) in {0,1}
  masked_ids = jnp.where(mask_ref[...] > 0, ids_ref[...], -1)   # (B, S) int32
  iota_v = jax.lax.broadcasted_iota(jnp.int32, (B, S, V), 2)
  onehot = (masked_ids[:, :, None] == iota_v).astype(f32)   # (B, S, V), 0 where masked
  wcount = jnp.sum(onehot, axis=1)                          # (B, V) masked histogram
  pooled_word = jnp.dot(wcount, word_emb_ref[...], preferred_element_type=f32)  # (B, H)
  mask_sum = jnp.sum(mask, axis=1, keepdims=True)           # (B, 1)
  t1 = jnp.sum(mask * tt, axis=1, keepdims=True)            # masked count of type-1
  t0 = mask_sum - t1
  te = type_emb_ref[...]                                    # (2, H)
  pooled = ((pooled_word + t0 * te[0:1, :] + t1 * te[1:2, :])
            * pl.reciprocal(mask_sum + 1e-6, approx=True))  # masked mean pool
  logits = jnp.dot(pooled, cls_w_ref[...], preferred_element_type=f32) + cls_b  # (B, C)

  # cross-entropy over classes, mean over batch (BertForSequenceClassification loss)
  lab = lab_ref[...]                                        # (B, 1) int32
  y_onehot = (lab == jax.lax.broadcasted_iota(jnp.int32, (B, ncls), 1)).astype(f32)
  m = jnp.max(logits, axis=1, keepdims=True)
  sh = logits - m
  lse = jnp.log(jnp.sum(jnp.exp(sh), axis=1, keepdims=True))
  nll = -jnp.sum(y_onehot * (sh - lse)) * (1.0 / B)
  loss_ref[...] = nll[None, None]

  # softmax over dim=0 (batch), exactly as documentLevelBert does
  m0 = jnp.max(logits, axis=0, keepdims=True)
  e0 = jnp.exp(logits - m0)
  x_probs = e0 * pl.reciprocal(jnp.sum(e0, axis=0, keepdims=True), approx=True)  # (B, C)

  # ---- additional_classifier on [x_probs | proc_out | Z_d] via split weights ---
  clf = (jnp.dot(x_probs, clf_w_log_ref[...], preferred_element_type=f32)
         + jnp.dot(proc_out, clf_w_proc_ref[...], preferred_element_type=f32)
         + jnp.dot(Z_d, clf_w_zd_ref[...], preferred_element_type=f32)
         + clf_b)                                           # (B, num_labels)
  clf_ref[...] = clf.astype(clf_ref.dtype)


_N_FUSED_INPUTS = 27


def _fused_call(B):
  # No grid: B=8 is one sublane group; all weights (~1.3 MB, dominated by the 1 MB
  # autoencoder encoder) fit in VMEM in a single step, so the kernel is one DMA fill
  # followed by a handful of small MXU matmuls — pipelining a grid over the AE K axis
  # would not beat the single-fill latency at this size.
  # TODO(synk): at serving batch sizes add a parallel batch grid (v7x megacore) and
  # bf16 MXU casts (v6e/v7x only), and re-check block VMEM vs v7x's 64 MiB budget.
  return pl.pallas_call(
      _dsc_rs_fused_kernel,
      out_shape=(jax.ShapeDtypeStruct((1, 1), jnp.float32),
                 jax.ShapeDtypeStruct((B, NUM_LABELS), jnp.float32)),
      in_specs=[pl.BlockSpec(memory_space=VMEM)] * _N_FUSED_INPUTS,
      out_specs=(pl.BlockSpec(memory_space=VMEM),
                 pl.BlockSpec(memory_space=VMEM)),
  )


# ============================= parameters / forward ===========================
def _pack_biases(wd_wide_b, wd_d1_b, wd_d2_b, wd_d3_b,
                 ncf_l1_b, ncf_l2_b, ncf_l3_b, ncf_out_b,
                 proc_b, cls_b, clf_b):
  """All small biases in one lane-dense (10,128) slab -> one DMA instead of ~12."""
  bp = jnp.zeros((10, 128), jnp.float32)
  bp = bp.at[0, :wd_d1_b.shape[0]].set(wd_d1_b)
  bp = bp.at[1, :wd_d2_b.shape[0]].set(wd_d2_b)
  bp = bp.at[2, :ncf_l1_b.shape[0]].set(ncf_l1_b)
  bp = bp.at[3, :ncf_l2_b.shape[0]].set(ncf_l2_b)
  bp = bp.at[4, :ncf_l3_b.shape[0]].set(ncf_l3_b)
  bp = bp.at[5, :proc_b.shape[0]].set(proc_b)
  bp = bp.at[6, :cls_b.shape[0]].set(cls_b)
  bp = bp.at[7, :clf_b.shape[0]].set(clf_b)
  bp = bp.at[8, 0].set(wd_wide_b[0] + wd_d3_b[0])   # folded: both add to the same (B,1)
  bp = bp.at[9, 0].set(ncf_out_b[0])
  return bp


def init_params(key):
  keys = iter(jax.random.split(key, 32))

  def dense(k, n_in, n_out):
    w = jax.random.normal(k, (n_in, n_out), jnp.float32) * (1.0 / jnp.sqrt(n_in))
    b = jnp.zeros((n_out,), jnp.float32)
    return w, b

  p = {}
  # Wide & Deep
  wd_wide_w, wd_wide_b = dense(next(keys), WIDE_DEEP["wide_dim"], WIDE_DEEP["output_dim"])
  wd_d1_w, wd_d1_b = dense(next(keys), WIDE_DEEP["deep_dim"], WIDE_DEEP["hidden_units"][0])
  wd_d2_w, wd_d2_b = dense(next(keys), WIDE_DEEP["hidden_units"][0], WIDE_DEEP["hidden_units"][1])
  wd_d3_w, wd_d3_b = dense(next(keys), WIDE_DEEP["hidden_units"][1], WIDE_DEEP["output_dim"])
  p["wd_wide_w"], p["wd_d1_w"], p["wd_d2_w"], p["wd_d3_w"] = wd_wide_w, wd_d1_w, wd_d2_w, wd_d3_w
  # NCF
  p["ncf_user_emb"] = jax.random.normal(next(keys), (NCF["num_users"], NCF["general_dim"]), jnp.float32) * 0.05
  p["ncf_item_emb"] = jax.random.normal(next(keys), (NCF["num_items"], NCF["general_dim"]), jnp.float32) * 0.05
  ncf_w1, ncf_l1_b = dense(next(keys), 2 * NCF["general_dim"], NCF["hidden_units"][0])
  ncf_w2, ncf_l2_b = dense(next(keys), NCF["hidden_units"][0], NCF["hidden_units"][1])
  ncf_w3, ncf_l3_b = dense(next(keys), NCF["hidden_units"][1], NCF["hidden_units"][2])
  ncf_wout, ncf_out_b = dense(next(keys), NCF["hidden_units"][2], NCF["output_dim"])
  p["ncf_w1"], p["ncf_w2"], p["ncf_w3"], p["ncf_out_w"] = ncf_w1, ncf_w2, ncf_w3, ncf_wout
  # Text autoencoder (decoder omitted: reconstruction is discarded in DSC_RS.forward)
  # TODO(synk): re-add the decoder weights/kernel if the reconstruction output is ever consumed.
  ae_enc_w, ae_enc_b = dense(next(keys), AUTOENC["input_dim"], AUTOENC["encoding_dim"])
  p["ae_enc_w"], p["ae_enc_b2d"] = ae_enc_w, ae_enc_b.reshape(1, -1)
  # Synthetic BERT stand-in (pretrained BertForSequenceClassification not loadable here)
  # TODO(synk): full pretrained BERT encoder is replaced by embeddings + masked mean pooling.
  p["bert_word_emb"] = jax.random.normal(next(keys), (VOCAB, BERT_HIDDEN), jnp.float32) * 0.05
  p["bert_type_emb"] = jax.random.normal(next(keys), (2, BERT_HIDDEN), jnp.float32) * 0.05
  bert_cls_w, bert_cls_b = dense(next(keys), BERT_HIDDEN, NUM_BERT_CLASSES)
  p["bert_cls_w"] = bert_cls_w
  # processing_layer: Linear(wd_out + ncf_out -> bert_input_dim)
  proc_w, proc_b = dense(next(keys), WIDE_DEEP["output_dim"] + NCF["output_dim"], BERT_INPUT_DIM)
  p["proc_w"] = proc_w
  # additional_classifier, pre-split along its input axis [logits | proc_out | Z_d]
  clf_in = NUM_BERT_CLASSES + BERT_INPUT_DIM + AUTOENC["encoding_dim"]
  clf_w, clf_b = dense(next(keys), clf_in, NUM_LABELS)
  p["clf_w_logits"] = clf_w[:NUM_BERT_CLASSES]
  p["clf_w_proc"] = clf_w[NUM_BERT_CLASSES:NUM_BERT_CLASSES + BERT_INPUT_DIM]
  p["clf_w_zd"] = clf_w[NUM_BERT_CLASSES + BERT_INPUT_DIM:]
  # packed biases (single VMEM slab)
  p["bias_pack"] = _pack_biases(wd_wide_b, wd_d1_b, wd_d2_b, wd_d3_b,
                                ncf_l1_b, ncf_l2_b, ncf_l3_b, ncf_out_b,
                                proc_b, bert_cls_b, clf_b)
  return p


def dsc_rs_forward(p, input_ids, attention_mask, token_type_ids, labels,
                   wide_input, deep_input, user_input, item_input, text_input):
  B = wide_input.shape[0]
  # NCF embedding lookups stay as two tiny XLA gathers: at B=8, DMA-ing the whole
  # lane-padded (10000,8)/(1000,8) tables into VMEM would cost more than fetching
  # the 8 needed rows here.
  # TODO(synk): move in-kernel (scalar-prefetch gather) once tables are lane-dense
  # or batch grows.
  u_feat = jnp.take(p["ncf_user_emb"], user_input, axis=0)
  i_feat = jnp.take(p["ncf_item_emb"], item_input, axis=0)

  loss, classifier_output = _fused_call(B)(
      wide_input, deep_input, u_feat, i_feat, text_input,
      input_ids.astype(jnp.int32), token_type_ids.astype(jnp.int32),
      attention_mask.astype(jnp.int32), labels.reshape(B, 1).astype(jnp.int32),
      p["wd_wide_w"], p["wd_d1_w"], p["wd_d2_w"], p["wd_d3_w"],
      p["ncf_w1"], p["ncf_w2"], p["ncf_w3"], p["ncf_out_w"],
      p["ae_enc_w"], p["ae_enc_b2d"],
      p["proc_w"],
      p["bert_word_emb"], p["bert_type_emb"], p["bert_cls_w"],
      p["clf_w_logits"], p["clf_w_proc"], p["clf_w_zd"],
      p["bias_pack"])
  return loss[0, 0], classifier_output


if __name__ == "__main__":
  key = jax.random.PRNGKey(0)
  pkey, dkey = jax.random.split(key)
  params = init_params(pkey)

  ks = jax.random.split(dkey, 8)
  input_ids = jax.random.randint(ks[0], (BATCH, SEQ), 0, VOCAB)
  attention_mask = jnp.ones((BATCH, SEQ), jnp.int32)
  token_type_ids = jnp.zeros((BATCH, SEQ), jnp.int32)
  labels = jax.random.randint(ks[1], (BATCH,), 0, NUM_BERT_CLASSES)
  wide_input = jax.random.normal(ks[2], (BATCH, WIDE_DEEP["wide_dim"]), jnp.float32)
  deep_input = jax.random.normal(ks[3], (BATCH, WIDE_DEEP["deep_dim"]), jnp.float32)
  user_input = jax.random.randint(ks[4], (BATCH,), 0, NCF["num_users"])
  item_input = jax.random.randint(ks[5], (BATCH,), 0, NCF["num_items"])
  text_input = jax.random.normal(ks[6], (BATCH, AUTOENC["input_dim"]), jnp.float32)

  fwd = jax.jit(functools.partial(dsc_rs_forward, params))
  x_loss, classifier_output = fwd(input_ids, attention_mask, token_type_ids, labels,
                                  wide_input, deep_input, user_input, item_input,
                                  text_input)
  jax.block_until_ready((x_loss, classifier_output))
  assert classifier_output.shape == (BATCH, NUM_LABELS)
  assert x_loss.shape == ()
  print("KERNEL_OK")
</pallas_src>

<mosaic_0001>
module attributes {stable_mosaic.version = 11 : i64} {
  func.func @_dsc_rs_fused_kernel(%arg0: memref<8x100xf32, #tpu.memory_space<vmem>>, %arg1: memref<8x64xf32, #tpu.memory_space<vmem>>, %arg2: memref<8x8xf32, #tpu.memory_space<vmem>>, %arg3: memref<8x8xf32, #tpu.memory_space<vmem>>, %arg4: memref<8x1024xf32, #tpu.memory_space<vmem>>, %arg5: memref<8x16xi32, #tpu.memory_space<vmem>>, %arg6: memref<8x16xi32, #tpu.memory_space<vmem>>, %arg7: memref<8x16xi32, #tpu.memory_space<vmem>>, %arg8: memref<8x1xi32, #tpu.memory_space<vmem>>, %arg9: memref<100x1xf32, #tpu.memory_space<vmem>>, %arg10: memref<64x128xf32, #tpu.memory_space<vmem>>, %arg11: memref<128x64xf32, #tpu.memory_space<vmem>>, %arg12: memref<64x1xf32, #tpu.memory_space<vmem>>, %arg13: memref<16x64xf32, #tpu.memory_space<vmem>>, %arg14: memref<64x32xf32, #tpu.memory_space<vmem>>, %arg15: memref<32x16xf32, #tpu.memory_space<vmem>>, %arg16: memref<16x1xf32, #tpu.memory_space<vmem>>, %arg17: memref<1024x256xf32, #tpu.memory_space<vmem>>, %arg18: memref<1x256xf32, #tpu.memory_space<vmem>>, %arg19: memref<2x32xf32, #tpu.memory_space<vmem>>, %arg20: memref<128x64xf32, #tpu.memory_space<vmem>>, %arg21: memref<2x64xf32, #tpu.memory_space<vmem>>, %arg22: memref<64x4xf32, #tpu.memory_space<vmem>>, %arg23: memref<4x3xf32, #tpu.memory_space<vmem>>, %arg24: memref<32x3xf32, #tpu.memory_space<vmem>>, %arg25: memref<256x3xf32, #tpu.memory_space<vmem>>, %arg26: memref<10x128xf32, #tpu.memory_space<vmem>>, %arg27: memref<1x1xf32, #tpu.memory_space<vmem>>, %arg28: memref<8x3xf32, #tpu.memory_space<vmem>>) attributes {dimension_semantics = [], scalar_prefetch = 0 : i64, scratch_operands = 0 : i64, tpu.core_type = #tpu.core_type<tc>} {
    %c0 = arith.constant 0 : index
    %c0_0 = arith.constant 0 : index
    %0 = vector.load %arg26[%c0, %c0_0] : memref<10x128xf32, #tpu.memory_space<vmem>>, vector<10x128xf32>
    %1 = vector.extract_strided_slice %0 {offsets = [0, 0], sizes = [1, 128], strides = [1, 1]} : vector<10x128xf32> to vector<1x128xf32>
    %2 = vector.extract_strided_slice %0 {offsets = [1, 0], sizes = [1, 64], strides = [1, 1]} : vector<10x128xf32> to vector<1x64xf32>
    %3 = vector.extract_strided_slice %0 {offsets = [2, 0], sizes = [1, 64], strides = [1, 1]} : vector<10x128xf32> to vector<1x64xf32>
    %4 = vector.extract_strided_slice %0 {offsets = [3, 0], sizes = [1, 32], strides = [1, 1]} : vector<10x128xf32> to vector<1x32xf32>
    %5 = vector.extract_strided_slice %0 {offsets = [4, 0], sizes = [1, 16], strides = [1, 1]} : vector<10x128xf32> to vector<1x16xf32>
    %6 = vector.extract_strided_slice %0 {offsets = [5, 0], sizes = [1, 32], strides = [1, 1]} : vector<10x128xf32> to vector<1x32xf32>
    %7 = vector.extract_strided_slice %0 {offsets = [6, 0], sizes = [1, 4], strides = [1, 1]} : vector<10x128xf32> to vector<1x4xf32>
    %8 = vector.extract_strided_slice %0 {offsets = [7, 0], sizes = [1, 3], strides = [1, 1]} : vector<10x128xf32> to vector<1x3xf32>
    %9 = vector.extract_strided_slice %0 {offsets = [8, 0], sizes = [1, 1], strides = [1, 1]} : vector<10x128xf32> to vector<1x1xf32>
    %10 = vector.extract_strided_slice %0 {offsets = [9, 0], sizes = [1, 1], strides = [1, 1]} : vector<10x128xf32> to vector<1x1xf32>
    %c0_1 = arith.constant 0 : index
    %c0_2 = arith.constant 0 : index
    %11 = vector.load %arg1[%c0_1, %c0_2] : memref<8x64xf32, #tpu.memory_space<vmem>>, vector<8x64xf32>
    %c0_3 = arith.constant 0 : index
    %c0_4 = arith.constant 0 : index
    %12 = vector.load %arg10[%c0_3, %c0_4] : memref<64x128xf32, #tpu.memory_space<vmem>>, vector<64x128xf32>
    %cst = arith.constant dense<0.000000e+00> : vector<8x128xf32>
    %13 = tpu.matmul %11, %12, %cst {dimension_numbers = #tpu.dot_dimension_numbers<[1], [0], [0], [1], [0, 0, 1, 1], [], []>} : vector<8x64xf32>, vector<64x128xf32>, vector<8x128xf32> -> vector<8x128xf32>
    %14 = vector.broadcast %1 : vector<1x128xf32> to vector<8x128xf32>
    %15 = arith.addf %13, %14 : vector<8x128xf32>
    %cst_5 = arith.constant 0.000000e+00 : f32
    %16 = vector.broadcast %cst_5 : f32 to vector<8x128xf32>
    %17 = arith.maximumf %15, %16 : vector<8x128xf32>
    %c0_6 = arith.constant 0 : index
    %c0_7 = arith.constant 0 : index
    %18 = vector.load %arg11[%c0_6, %c0_7] : memref<128x64xf32, #tpu.memory_space<vmem>>, vector<128x64xf32>
    %cst_8 = arith.constant dense<0.000000e+00> : vector<8x64xf32>
    %19 = tpu.matmul %17, %18, %cst_8 {dimension_numbers = #tpu.dot_dimension_numbers<[1], [0], [0], [1], [0, 0, 1, 1], [], []>} : vector<8x128xf32>, vector<128x64xf32>, vector<8x64xf32> -> vector<8x64xf32>
    %20 = vector.broadcast %2 : vector<1x64xf32> to vector<8x64xf32>
    %21 = arith.addf %19, %20 : vector<8x64xf32>
    %cst_9 = arith.constant 0.000000e+00 : f32
    %22 = vector.broadcast %cst_9 : f32 to vector<8x64xf32>
    %23 = arith.maximumf %21, %22 : vector<8x64xf32>
    %c0_10 = arith.constant 0 : index
    %c0_11 = arith.constant 0 : index
    %24 = vector.load %arg0[%c0_10, %c0_11] : memref<8x100xf32, #tpu.memory_space<vmem>>, vector<8x100xf32>
    %c0_12 = arith.constant 0 : index
    %c0_13 = arith.constant 0 : index
    %25 = vector.load %arg9[%c0_12, %c0_13] : memref<100x1xf32, #tpu.memory_space<vmem>>, vector<100x1xf32>
    %cst_14 = arith.constant dense<0.000000e+00> : vector<8x1xf32>
    %26 = tpu.matmul %24, %25, %cst_14 {dimension_numbers = #tpu.dot_dimension_numbers<[1], [0], [0], [1], [0, 0, 1, 1], [], []>} : vector<8x100xf32>, vector<100x1xf32>, vector<8x1xf32> -> vector<8x1xf32>
    %c0_15 = arith.constant 0 : index
    %c0_16 = arith.constant 0 : index
    %27 = vector.load %arg12[%c0_15, %c0_16] : memref<64x1xf32, #tpu.memory_space<vmem>>, vector<64x1xf32>
    %cst_17 = arith.constant dense<0.000000e+00> : vector<8x1xf32>
    %28 = tpu.matmul %23, %27, %cst_17 {dimension_numbers = #tpu.dot_dimension_numbers<[1], [0], [0], [1], [0, 0, 1, 1], [], []>} : vector<8x64xf32>, vector<64x1xf32>, vector<8x1xf32> -> vector<8x1xf32>
    %29 = arith.addf %26, %28 : vector<8x1xf32>
    %30 = vector.broadcast %9 : vector<1x1xf32> to vector<8x1xf32>
    %31 = arith.addf %29, %30 : vector<8x1xf32>
    %c0_18 = arith.constant 0 : index
    %c0_19 = arith.constant 0 : index
    %32 = vector.load %arg13[%c0_18, %c0_19] : memref<16x64xf32, #tpu.memory_space<vmem>>, vector<16x64xf32>
    %c0_20 = arith.constant 0 : index
    %c0_21 = arith.constant 0 : index
    %33 = vector.load %arg2[%c0_20, %c0_21] : memref<8x8xf32, #tpu.memory_space<vmem>>, vector<8x8xf32>
    %34 = vector.extract_strided_slice %32 {offsets = [0, 0], sizes = [8, 64], strides = [1, 1]} : vector<16x64xf32> to vector<8x64xf32>
    %cst_22 = arith.constant dense<0.000000e+00> : vector<8x64xf32>
    %35 = tpu.matmul %33, %34, %cst_22 {dimension_numbers = #tpu.dot_dimension_numbers<[1], [0], [0], [1], [0, 0, 1, 1], [], []>} : vector<8x8xf32>, vector<8x64xf32>, vector<8x64xf32> -> vector<8x64xf32>
    %c0_23 = arith.constant 0 : index
    %c0_24 = arith.constant 0 : index
    %36 = vector.load %arg3[%c0_23, %c0_24] : memref<8x8xf32, #tpu.memory_space<vmem>>, vector<8x8xf32>
    %37 = vector.extract_strided_slice %32 {offsets = [8, 0], sizes = [8, 64], strides = [1, 1]} : vector<16x64xf32> to vector<8x64xf32>
    %cst_25 = arith.constant dense<0.000000e+00> : vector<8x64xf32>
    %38 = tpu.matmul %36, %37, %cst_25 {dimension_numbers = #tpu.dot_dimension_numbers<[1], [0], [0], [1], [0, 0, 1, 1], [], []>} : vector<8x8xf32>, vector<8x64xf32>, vector<8x64xf32> -> vector<8x64xf32>
    %39 = arith.addf %35, %38 : vector<8x64xf32>
    %40 = vector.broadcast %3 : vector<1x64xf32> to vector<8x64xf32>
    %41 = arith.addf %39, %40 : vector<8x64xf32>
    %cst_26 = arith.constant 0.000000e+00 : f32
    %42 = vector.broadcast %cst_26 : f32 to vector<8x64xf32>
    %43 = arith.maximumf %41, %42 : vector<8x64xf32>
    %c0_27 = arith.constant 0 : index
    %c0_28 = arith.constant 0 : index
    %44 = vector.load %arg14[%c0_27, %c0_28] : memref<64x32xf32, #tpu.memory_space<vmem>>, vector<64x32xf32>
    %cst_29 = arith.constant dense<0.000000e+00> : vector<8x32xf32>
    %45 = tpu.matmul %43, %44, %cst_29 {dimension_numbers = #tpu.dot_dimension_numbers<[1], [0], [0], [1], [0, 0, 1, 1], [], []>} : vector<8x64xf32>, vector<64x32xf32>, vector<8x32xf32> -> vector<8x32xf32>
    %46 = vector.broadcast %4 : vector<1x32xf32> to vector<8x32xf32>
    %47 = arith.addf %45, %46 : vector<8x32xf32>
    %cst_30 = arith.constant 0.000000e+00 : f32
    %48 = vector.broadcast %cst_30 : f32 to vector<8x32xf32>
    %49 = arith.maximumf %47, %48 : vector<8x32xf32>
    %c0_31 = arith.constant 0 : index
    %c0_32 = arith.constant 0 : index
    %50 = vector.load %arg15[%c0_31, %c0_32] : memref<32x16xf32, #tpu.memory_space<vmem>>, vector<32x16xf32>
    %cst_33 = arith.constant dense<0.000000e+00> : vector<8x16xf32>
    %51 = tpu.matmul %49, %50, %cst_33 {dimension_numbers = #tpu.dot_dimension_numbers<[1], [0], [0], [1], [0, 0, 1, 1], [], []>} : vector<8x32xf32>, vector<32x16xf32>, vector<8x16xf32> -> vector<8x16xf32>
    %52 = vector.broadcast %5 : vector<1x16xf32> to vector<8x16xf32>
    %53 = arith.addf %51, %52 : vector<8x16xf32>
    %cst_34 = arith.constant 0.000000e+00 : f32
    %54 = vector.broadcast %cst_34 : f32 to vector<8x16xf32>
    %55 = arith.maximumf %53, %54 : vector<8x16xf32>
    %c0_35 = arith.constant 0 : index
    %c0_36 = arith.constant 0 : index
    %56 = vector.load %arg16[%c0_35, %c0_36] : memref<16x1xf32, #tpu.memory_space<vmem>>, vector<16x1xf32>
    %cst_37 = arith.constant dense<0.000000e+00> : vector<8x1xf32>
    %57 = tpu.matmul %55, %56, %cst_37 {dimension_numbers = #tpu.dot_dimension_numbers<[1], [0], [0], [1], [0, 0, 1, 1], [], []>} : vector<8x16xf32>, vector<16x1xf32>, vector<8x1xf32> -> vector<8x1xf32>
    %58 = vector.broadcast %10 : vector<1x1xf32> to vector<8x1xf32>
    %59 = arith.addf %57, %58 : vector<8x1xf32>
    %c0_38 = arith.constant 0 : index
    %c0_39 = arith.constant 0 : index
    %60 = vector.load %arg4[%c0_38, %c0_39] : memref<8x1024xf32, #tpu.memory_space<vmem>>, vector<8x1024xf32>
    %c0_40 = arith.constant 0 : index
    %c0_41 = arith.constant 0 : index
    %61 = vector.load %arg17[%c0_40, %c0_41] : memref<1024x256xf32, #tpu.memory_space<vmem>>, vector<1024x256xf32>
    %cst_42 = arith.constant dense<0.000000e+00> : vector<8x256xf32>
    %62 = tpu.matmul %60, %61, %cst_42 {dimension_numbers = #tpu.dot_dimension_numbers<[1], [0], [0], [1], [0, 0, 1, 1], [], []>} : vector<8x1024xf32>, vector<1024x256xf32>, vector<8x256xf32> -> vector<8x256xf32>
    %c0_43 = arith.constant 0 : index
    %c0_44 = arith.constant 0 : index
    %63 = vector.load %arg18[%c0_43, %c0_44] : memref<1x256xf32, #tpu.memory_space<vmem>>, vector<1x256xf32>
    %64 = vector.broadcast %63 : vector<1x256xf32> to vector<8x256xf32>
    %65 = arith.addf %62, %64 : vector<8x256xf32>
    %cst_45 = arith.constant 0.000000e+00 : f32
    %66 = vector.broadcast %cst_45 : f32 to vector<8x256xf32>
    %67 = arith.maximumf %65, %66 : vector<8x256xf32>
    %c0_46 = arith.constant 0 : index
    %c0_47 = arith.constant 0 : index
    %68 = vector.load %arg19[%c0_46, %c0_47] : memref<2x32xf32, #tpu.memory_space<vmem>>, vector<2x32xf32>
    %69 = vector.extract_strided_slice %68 {offsets = [0, 0], sizes = [1, 32], strides = [1, 1]} : vector<2x32xf32> to vector<1x32xf32>
    %70 = vector.broadcast %31 : vector<8x1xf32> to vector<8x32xf32>
    %71 = vector.broadcast %69 : vector<1x32xf32> to vector<8x32xf32>
    %72 = arith.mulf %70, %71 : vector<8x32xf32>
    %73 = vector.extract_strided_slice %68 {offsets = [1, 0], sizes = [1, 32], strides = [1, 1]} : vector<2x32xf32> to vector<1x32xf32>
    %74 = vector.broadcast %59 : vector<8x1xf32> to vector<8x32xf32>
    %75 = vector.broadcast %73 : vector<1x32xf32> to vector<8x32xf32>
    %76 = arith.mulf %74, %75 : vector<8x32xf32>
    %77 = arith.addf %72, %76 : vector<8x32xf32>
    %78 = vector.broadcast %6 : vector<1x32xf32> to vector<8x32xf32>
    %79 = arith.addf %77, %78 : vector<8x32xf32>
    %c0_48 = arith.constant 0 : index
    %c0_49 = arith.constant 0 : index
    %80 = vector.load %arg7[%c0_48, %c0_49] : memref<8x16xi32, #tpu.memory_space<vmem>>, vector<8x16xi32>
    %81 = arith.sitofp %80 : vector<8x16xi32> to vector<8x16xf32>
    %c0_50 = arith.constant 0 : index
    %c0_51 = arith.constant 0 : index
    %82 = vector.load %arg6[%c0_50, %c0_51] : memref<8x16xi32, #tpu.memory_space<vmem>>, vector<8x16xi32>
    %83 = arith.sitofp %82 : vector<8x16xi32> to vector<8x16xf32>
    %c0_52 = arith.constant 0 : index
    %c0_53 = arith.constant 0 : index
    %84 = vector.load %arg7[%c0_52, %c0_53] : memref<8x16xi32, #tpu.memory_space<vmem>>, vector<8x16xi32>
    %c0_i32 = arith.constant 0 : i32
    %85 = vector.broadcast %c0_i32 : i32 to vector<8x16xi32>
    %86 = arith.cmpi sgt, %84, %85 : vector<8x16xi32>
    %c0_54 = arith.constant 0 : index
    %c0_55 = arith.constant 0 : index
    %87 = vector.load %arg5[%c0_54, %c0_55] : memref<8x16xi32, #tpu.memory_space<vmem>>, vector<8x16xi32>
    %c-1_i32 = arith.constant -1 : i32
    %88 = vector.broadcast %c-1_i32 : i32 to vector<8x16xi32>
    %89 = arith.select %86, %87, %88 : vector<8x16xi1>, vector<8x16xi32>
    %90 = tpu.iota {dimensions = array<i32: 2>} : vector<8x16x128xi32>
    %91 = vector.shape_cast %89 : vector<8x16xi32> to vector<8x16x1xi32>
    %92 = vector.broadcast %91 : vector<8x16x1xi32> to vector<8x16x128xi32>
    %93 = arith.cmpi eq, %92, %90 : vector<8x16x128xi32>
    %94 = arith.extui %93 : vector<8x16x128xi1> to vector<8x16x128xi32>
    %95 = arith.sitofp %94 : vector<8x16x128xi32> to vector<8x16x128xf32>
    %cst_56 = arith.constant dense<0.000000e+00> : vector<8x128xf32>
    %96 = vector.multi_reduction <add>, %95, %cst_56 [1] : vector<8x16x128xf32> to vector<8x128xf32>
    %c0_57 = arith.constant 0 : index
    %c0_58 = arith.constant 0 : index
    %97 = vector.load %arg20[%c0_57, %c0_58] : memref<128x64xf32, #tpu.memory_space<vmem>>, vector<128x64xf32>
    %cst_59 = arith.constant dense<0.000000e+00> : vector<8x64xf32>
    %98 = tpu.matmul %96, %97, %cst_59 {dimension_numbers = #tpu.dot_dimension_numbers<[1], [0], [0], [1], [0, 0, 1, 1], [], []>} : vector<8x128xf32>, vector<128x64xf32>, vector<8x64xf32> -> vector<8x64xf32>
    %cst_60 = arith.constant dense<0.000000e+00> : vector<8xf32>
    %99 = vector.multi_reduction <add>, %81, %cst_60 [1] : vector<8x16xf32> to vector<8xf32>
    %100 = vector.shape_cast %99 : vector<8xf32> to vector<8x1xf32>
    %101 = arith.mulf %81, %83 : vector<8x16xf32>
    %cst_61 = arith.constant dense<0.000000e+00> : vector<8xf32>
    %102 = vector.multi_reduction <add>, %101, %cst_61 [1] : vector<8x16xf32> to vector<8xf32>
    %103 = vector.shape_cast %102 : vector<8xf32> to vector<8x1xf32>
    %104 = arith.subf %100, %103 : vector<8x1xf32>
    %c0_62 = arith.constant 0 : index
    %c0_63 = arith.constant 0 : index
    %105 = vector.load %arg21[%c0_62, %c0_63] : memref<2x64xf32, #tpu.memory_space<vmem>>, vector<2x64xf32>
    %106 = vector.extract_strided_slice %105 {offsets = [0, 0], sizes = [1, 64], strides = [1, 1]} : vector<2x64xf32> to vector<1x64xf32>
    %107 = vector.broadcast %104 : vector<8x1xf32> to vector<8x64xf32>
    %108 = vector.broadcast %106 : vector<1x64xf32> to vector<8x64xf32>
    %109 = arith.mulf %107, %108 : vector<8x64xf32>
    %110 = arith.addf %98, %109 : vector<8x64xf32>
    %111 = vector.extract_strided_slice %105 {offsets = [1, 0], sizes = [1, 64], strides = [1, 1]} : vector<2x64xf32> to vector<1x64xf32>
    %112 = vector.broadcast %103 : vector<8x1xf32> to vector<8x64xf32>
    %113 = vector.broadcast %111 : vector<1x64xf32> to vector<8x64xf32>
    %114 = arith.mulf %112, %113 : vector<8x64xf32>
    %115 = arith.addf %110, %114 : vector<8x64xf32>
    %cst_64 = arith.constant 9.99999997E-7 : f32
    %116 = vector.broadcast %cst_64 : f32 to vector<8x1xf32>
    %117 = arith.addf %100, %116 : vector<8x1xf32>
    %118 = tpu.reciprocal %117 {approx = true} : vector<8x1xf32> -> vector<8x1xf32>
    %119 = vector.broadcast %118 : vector<8x1xf32> to vector<8x64xf32>
    %120 = arith.mulf %115, %119 : vector<8x64xf32>
    %c0_65 = arith.constant 0 : index
    %c0_66 = arith.constant 0 : index
    %121 = vector.load %arg22[%c0_65, %c0_66] : memref<64x4xf32, #tpu.memory_space<vmem>>, vector<64x4xf32>
    %cst_67 = arith.constant dense<0.000000e+00> : vector<8x4xf32>
    %122 = tpu.matmul %120, %121, %cst_67 {dimension_numbers = #tpu.dot_dimension_numbers<[1], [0], [0], [1], [0, 0, 1, 1], [], []>} : vector<8x64xf32>, vector<64x4xf32>, vector<8x4xf32> -> vector<8x4xf32>
    %123 = vector.broadcast %7 : vector<1x4xf32> to vector<8x4xf32>
    %124 = arith.addf %122, %123 : vector<8x4xf32>
    %c0_68 = arith.constant 0 : index
    %c0_69 = arith.constant 0 : index
    %125 = vector.load %arg8[%c0_68, %c0_69] : memref<8x1xi32, #tpu.memory_space<vmem>>, vector<8x1xi32>
    %126 = tpu.iota {dimensions = array<i32: 1>} : vector<8x4xi32>
    %127 = vector.broadcast %125 : vector<8x1xi32> to vector<8x4xi32>
    %128 = arith.cmpi eq, %127, %126 : vector<8x4xi32>
    %129 = arith.extui %128 : vector<8x4xi1> to vector<8x4xi32>
    %130 = arith.sitofp %129 : vector<8x4xi32> to vector<8x4xf32>
    %cst_70 = arith.constant dense<0xFF800000> : vector<8xf32>
    %131 = vector.multi_reduction <maximumf>, %124, %cst_70 [1] : vector<8x4xf32> to vector<8xf32>
    %132 = vector.shape_cast %131 : vector<8xf32> to vector<8x1xf32>
    %133 = vector.broadcast %132 : vector<8x1xf32> to vector<8x4xf32>
    %134 = arith.subf %124, %133 : vector<8x4xf32>
    %135 = math.exp %134 : vector<8x4xf32>
    %cst_71 = arith.constant dense<0.000000e+00> : vector<8xf32>
    %136 = vector.multi_reduction <add>, %135, %cst_71 [1] : vector<8x4xf32> to vector<8xf32>
    %137 = vector.shape_cast %136 : vector<8xf32> to vector<8x1xf32>
    %138 = math.log %137 : vector<8x1xf32>
    %139 = vector.broadcast %138 : vector<8x1xf32> to vector<8x4xf32>
    %140 = arith.subf %134, %139 : vector<8x4xf32>
    %141 = arith.mulf %130, %140 : vector<8x4xf32>
    %142 = vector.shape_cast %141 : vector<8x4xf32> to vector<1x8x4xf32>
    %cst_72 = arith.constant dense<0.000000e+00> : vector<1xf32>
    %143 = vector.multi_reduction <add>, %142, %cst_72 [1, 2] : vector<1x8x4xf32> to vector<1xf32>
    %144 = vector.shape_cast %143 : vector<1xf32> to vector<1x1x1xf32>
    %145 = vector.extract %144[0, 0, 0] : f32 from vector<1x1x1xf32>
    %cst_73 = arith.constant 0.000000e+00 : f32
    %146 = arith.subf %cst_73, %145 : f32
    %cst_74 = arith.constant 1.250000e-01 : f32
    %147 = arith.mulf %146, %cst_74 : f32
    %148 = vector.broadcast %147 : f32 to vector<1x1xf32>
    %c0_75 = arith.constant 0 : index
    %c0_76 = arith.constant 0 : index
    %149 = vector.load %arg27[%c0_75, %c0_76] : memref<1x1xf32, #tpu.memory_space<vmem>>, vector<1x1xf32>
    tpu.vector_store %arg27[%c0_75, %c0_76], %148 {strides = array<i32>} : memref<1x1xf32, #tpu.memory_space<vmem>>, vector<1x1xf32>,
    %cst_77 = arith.constant dense<0xFF800000> : vector<4xf32>
    %150 = vector.multi_reduction <maximumf>, %124, %cst_77 [0] : vector<8x4xf32> to vector<4xf32>
    %151 = vector.shape_cast %150 : vector<4xf32> to vector<1x4xf32>
    %152 = vector.broadcast %151 : vector<1x4xf32> to vector<8x4xf32>
    %153 = arith.subf %124, %152 : vector<8x4xf32>
    %154 = math.exp %153 : vector<8x4xf32>
    %cst_78 = arith.constant dense<0.000000e+00> : vector<4xf32>
    %155 = vector.multi_reduction <add>, %154, %cst_78 [0] : vector<8x4xf32> to vector<4xf32>
    %156 = vector.shape_cast %155 : vector<4xf32> to vector<1x4xf32>
    %157 = tpu.reciprocal %156 {approx = true} : vector<1x4xf32> -> vector<1x4xf32>
    %158 = vector.broadcast %157 : vector<1x4xf32> to vector<8x4xf32>
    %159 = arith.mulf %154, %158 : vector<8x4xf32>
    %c0_79 = arith.constant 0 : index
    %c0_80 = arith.constant 0 : index
    %160 = vector.load %arg23[%c0_79, %c0_80] : memref<4x3xf32, #tpu.memory_space<vmem>>, vector<4x3xf32>
    %cst_81 = arith.constant dense<0.000000e+00> : vector<8x3xf32>
    %161 = tpu.matmul %159, %160, %cst_81 {dimension_numbers = #tpu.dot_dimension_numbers<[1], [0], [0], [1], [0, 0, 1, 1], [], []>} : vector<8x4xf32>, vector<4x3xf32>, vector<8x3xf32> -> vector<8x3xf32>
    %c0_82 = arith.constant 0 : index
    %c0_83 = arith.constant 0 : index
    %162 = vector.load %arg24[%c0_82, %c0_83] : memref<32x3xf32, #tpu.memory_space<vmem>>, vector<32x3xf32>
    %cst_84 = arith.constant dense<0.000000e+00> : vector<8x3xf32>
    %163 = tpu.matmul %79, %162, %cst_84 {dimension_numbers = #tpu.dot_dimension_numbers<[1], [0], [0], [1], [0, 0, 1, 1], [], []>} : vector<8x32xf32>, vector<32x3xf32>, vector<8x3xf32> -> vector<8x3xf32>
    %164 = arith.addf %161, %163 : vector<8x3xf32>
    %c0_85 = arith.constant 0 : index
    %c0_86 = arith.constant 0 : index
    %165 = vector.load %arg25[%c0_85, %c0_86] : memref<256x3xf32, #tpu.memory_space<vmem>>, vector<256x3xf32>
    %cst_87 = arith.constant dense<0.000000e+00> : vector<8x3xf32>
    %166 = tpu.matmul %67, %165, %cst_87 {dimension_numbers = #tpu.dot_dimension_numbers<[1], [0], [0], [1], [0, 0, 1, 1], [], []>} : vector<8x256xf32>, vector<256x3xf32>, vector<8x3xf32> -> vector<8x3xf32>
    %167 = arith.addf %164, %166 : vector<8x3xf32>
    %168 = vector.broadcast %8 : vector<1x3xf32> to vector<8x3xf32>
    %169 = arith.addf %167, %168 : vector<8x3xf32>
    %c0_88 = arith.constant 0 : index
    %c0_89 = arith.constant 0 : index
    %170 = vector.load %arg28[%c0_88, %c0_89] : memref<8x3xf32, #tpu.memory_space<vmem>>, vector<8x3xf32>
    tpu.vector_store %arg28[%c0_88, %c0_89], %169 {strides = array<i32>} : memref<8x3xf32, #tpu.memory_space<vmem>>, vector<8x3xf32>,
    return
  }
}

</mosaic_0001>

<bundles_post_ra>
// kernel: dsc_rs_forward.1
= control target key start
LH: loop header
LB: loop body
LE: loop exit
PB: predicated region body
PF: predicated region fallthrough
CT: control target
= control target key end

     0   :  { %s3016_s0 = inlined_call_operand.hbm [shape: f32[8,100], index: 0, kind: input, shape index: {}]   ;;  %s3017_s1 = inlined_call_operand.hbm [shape: f32[8,64], index: 1, kind: input, shape index: {}]   ;;  %s3018_s2 = inlined_call_operand.vmem [shape: f32[8,8], index: 2, kind: input, shape index: {}]   ;;  %s3019_s3 = inlined_call_operand.vmem [shape: f32[8,8], index: 3, kind: input, shape index: {}]   ;;  %s3020_s4 = inlined_call_operand.hbm [shape: f32[8,1024], index: 4, kind: input, shape index: {}]   ;;  %s3021_s5 = inlined_call_operand.hbm [shape: s32[8,16], index: 5, kind: input, shape index: {}]   ;;  %s3022_s6 = inlined_call_operand.hbm [shape: s32[8,16], index: 6, kind: input, shape index: {}]   ;;  %s3023_s7 = inlined_call_operand.hbm [shape: s32[8,16], index: 7, kind: input, shape index: {}]   ;;  %s3024_s8 = inlined_call_operand.vmem [shape: s32[8,1], index: 8, kind: input, shape index: {}]   ;;  %s3025_s9 = inlined_call_operand.hbm [shape: f32[100,1], index: 9, kind: input, shape index: {}]   ;;  %s3026_s10 = inlined_call_operand.hbm [shape: f32[64,128], index: 10, kind: input, shape index: {}]   ;;  %s3027_s11 = inlined_call_operand.hbm [shape: f32[128,64], index: 11, kind: input, shape index: {}]   ;;  %s3028_s12 = inlined_call_operand.hbm [shape: f32[64,1], index: 12, kind: input, shape index: {}]   ;;  %s3029_s13 = inlined_call_operand.hbm [shape: f32[16,64], index: 13, kind: input, shape index: {}]   ;;  %s3030_s14 = inlined_call_operand.hbm [shape: f32[64,32], index: 14, kind: input, shape index: {}]   ;;  %s3031_s15 = inlined_call_operand.hbm [shape: f32[32,16], index: 15, kind: input, shape index: {}]   ;;  %s3032_s16 = inlined_call_operand.hbm [shape: f32[16,1], index: 16, kind: input, shape index: {}]   ;;  %s3033_s17 = inlined_call_operand.hbm [shape: f32[1024,256], index: 17, kind: input, shape index: {}]   ;;  %s3034_s18 = inlined_call_operand.vmem [shape: f32[1,256], index: 18, kind: input, shape index: {}]   ;;  %s3035_s19 = inlined_call_operand.hbm [shape: f32[2,32], index: 19, kind: input, shape index: {}]   ;;  %s3036_s20 = inlined_call_operand.hbm [shape: f32[128,64], index: 20, kind: input, shape index: {}]   ;;  %s3037_s21 = inlined_call_operand.hbm [shape: f32[2,64], index: 21, kind: input, shape index: {}]   ;;  %s3038_s22 = inlined_call_operand.hbm [shape: f32[64,4], index: 22, kind: input, shape index: {}]   ;;  %s3039_s23 = inlined_call_operand.hbm [shape: f32[4,3], index: 23, kind: input, shape index: {}]   ;;  %s3040_s24 = inlined_call_operand.hbm [shape: f32[32,3], index: 24, kind: input, shape index: {}]   ;;  %s3041_s25 = inlined_call_operand.hbm [shape: f32[256,3], index: 25, kind: input, shape index: {}]   ;;  %s3042_s26 = inlined_call_operand.vmem [shape: f32[10,128], index: 26, kind: input, shape index: {}]   ;;  %s3043_s27 = inlined_call_operand.hbm [shape: f32[1,1], index: 27, kind: output, shape index: {0}]   ;;  %s3044_s28 = inlined_call_operand.vmem [shape: f32[8,3], index: 28, kind: output, shape index: {1}]  }
   0x1   :  { %3045 = sst [smem:[#allocation51_spill]] %s3016_s0 }
   0x2   :  { %3046 = sst [smem:[#allocation52_spill]] %s3017_s1 }
   0x3   :  { %3047 = sst [smem:[#allocation53_spill]] %s3018_s2 }
   0x4   :  { %3048 = sst [smem:[#allocation54_spill]] %s3019_s3 }
   0x5   :  { %3049 = sst [smem:[#allocation55_spill]] %s3020_s4 }
   0x6   :  { %3050 = sst [smem:[#allocation56_spill]] %s3021_s5 }
   0x7   :  { %3051 = sst [smem:[#allocation57_spill]] %s3022_s6 }
   0x8   :  { %3052 = sst [smem:[#allocation58_spill]] %s3023_s7 }
   0x9   :  { %3053 = sst [smem:[#allocation59_spill]] %s3024_s8 }
   0xa   :  { %3054 = sst [smem:[#allocation60_spill]] %s3025_s9 }
   0xb   :  { %3055 = sst [smem:[#allocation61_spill]] %s3026_s10 }
   0xc   :  { %3056 = sst [smem:[#allocation62_spill]] %s3027_s11 }
   0xd   :  { %3057 = sst [smem:[#allocation63_spill]] %s3028_s12 }
   0xe   :  { %3058 = sst [smem:[#allocation64_spill]] %s3034_s18 }
   0xf   :  { %3059 = sst [smem:[#allocation65_spill]] %s3043_s27 }
  0x10   :  { %3060 = sst [smem:[#allocation66_spill]] %s3044_s28 }
  0x11   :  { %34 = vsyncpa [#allocation3], 0 }
  0x12   :  { %35 = vsyncpa [#allocation6], 0 }
  0x13   :  { %36 = vsyncpa [#allocation9], 0 }
  0x14   :  { %37 = vsyncpa [#allocation12], 0 }
  0x15   :  { %38 = vsyncpa [#allocation15], 0 }
  0x16   :  { %39 = vsyncpa [#allocation18], 0 }
  0x17   :  { %40 = vsyncpa [#allocation21], 0 }
  0x18   :  { %41 = vsyncpa [#allocation24], 0 }
  0x19   :  { %42 = vsyncpa [#allocation27], 0 }
  0x1a   :  { %43 = vsyncpa [#allocation30], 0 }
  0x1b   :  { %44 = vsyncpa [#allocation33], 0 }
  0x1c   :  { %45 = vsyncpa [#allocation36], 0  ;;  %s3061_s9 = sld [smem:[#allocation52_spill]] }
  0x22   :  { %s63_s30 = sshll.u32 %s3061_s9, 4  ;;  %s64_s30 = int_to_ptr.hbm [resolvable:$true] %s63_s30 }
  0x23   :  { %46 = vsyncpa [#allocation4], 0  ;;  %s2524_s3 = smov [#allocation5]   ;;  %s3062_s11 = sld [smem:[#allocation56_spill]] }
  0x24   :  { %s65_s6 = sshll.u32 %s2524_s3, 4  ;;  %s2525_s2 = smov [#allocation8]   ;;  %s66_s6 = int_to_ptr.vmem [resolvable:$true] %s65_s6 }
  0x25   :  { %68 = dma.hbm_to_vmem [thread:$0]  %s64_s30, 128, %s66_s6, [#allocation6]  }
  0x26   :  { %s91_s7 = sshll.u32 %s2525_s2, 4  ;;  %s3063_s4 = sld [smem:[#allocation58_spill]]  ;;  %s92_s7 = int_to_ptr.vmem [resolvable:$true] %s91_s7 }
  0x27   :  { %s2526_s8 = smov [#allocation11]   ;;  %s3064_s28 = sld [smem:[#allocation61_spill]] }
  0x28   :  { %s113_s5 = sshll.u32 %s2526_s8, 4  ;;  %s2527_s30 = smov [#allocation14]   ;;  %s114_s5 = int_to_ptr.vmem [resolvable:$true] %s113_s5 }
  0x29   :  { %s89_s29 = sshll.u32 %s3062_s11, 4  ;;  %s138_s6 = sshll.u32 %s2527_s30, 4  ;;  %s90_s29 = int_to_ptr.hbm [resolvable:$true] %s89_s29  ;;  %s139_s6 = int_to_ptr.vmem [resolvable:$true] %s138_s6 }
  0x2a   :  { %94 = dma.hbm_to_vmem [thread:$0]  %s90_s29, 128, %s92_s7, [#allocation9]  }
  0x2b   :  { %s3065_s11 = sld [smem:[#allocation63_spill]]  ;;  %s2528_s12 = smov 128  }
  0x2c   :  { %s111_s27 = sshll.u32 %s3063_s4, 4  ;;  %s2529_s1 = smov 8   ;;  %s112_s27 = int_to_ptr.hbm [resolvable:$true] %s111_s27 }
  0x2d   :  { %s136_s18 = sshll.u32 %s3064_s28, 4  ;;  %s188_s28 = sshll.u32 %s3030_s14, 4  ;;  %s137_s18 = int_to_ptr.hbm [resolvable:$true] %s136_s18  ;;  %s189_s28 = int_to_ptr.hbm [resolvable:$true] %s188_s28 }
  0x2e   :  { %116 = dma.hbm_to_vmem [thread:$0]  %s112_s27, 128, %s114_s5, [#allocation12]  }
  0x2f   :  { %144 = dma.hbm_to_vmem [thread:$0]  %s137_s18, 1024, %s139_s6, [#allocation15], %s2528_s12, %s2528_s12, %s2529_s1  }
  0x30   :  { %s2530_s27 = smov [#allocation17]   ;;  %s2531_s8 = smov [#allocation20]  }
  0x31   :  { %s162_s2 = sshll.u32 %s3065_s11, 4  ;;  %s164_s4 = sshll.u32 %s2530_s27, 4  ;;  %s163_s2 = int_to_ptr.hbm [resolvable:$true] %s162_s2  ;;  %s165_s4 = int_to_ptr.vmem [resolvable:$true] %s164_s4 }
  0x32   :  { %170 = dma.hbm_to_vmem [thread:$0]  %s163_s2, 1024, %s165_s4, [#allocation18], %s2528_s12, %s2528_s12, %s2529_s1  }
  0x33   :  { %s190_s5 = sshll.u32 %s2531_s8, 4  ;;  %s214_s30 = sshll.u32 %s3032_s16, 4  ;;  %s191_s5 = int_to_ptr.vmem [resolvable:$true] %s190_s5  ;;  %s215_s30 = int_to_ptr.hbm [resolvable:$true] %s214_s30 }
  0x34   :  { %196 = dma.hbm_to_vmem [thread:$0]  %s189_s28, 1024, %s191_s5, [#allocation21], %s2528_s12, %s2528_s12, %s2529_s1  }
  0x35   :  { %s243_s6 = sshll.u32 %s3035_s19, 4  ;;  %s2532_s10 = smov [#allocation23]   ;;  %s244_s6 = int_to_ptr.hbm [resolvable:$true] %s243_s6 }
  0x36   :  { %s216_s0 = sshll.u32 %s2532_s10, 4  ;;  %s2533_s11 = smov [#allocation26]   ;;  %s217_s0 = int_to_ptr.vmem [resolvable:$true] %s216_s0 }
  0x37   :  { %222 = dma.hbm_to_vmem [thread:$0]  %s215_s30, 256, %s217_s0, [#allocation24], %s2528_s12, %s2528_s12, %s2529_s1  }
  0x38   :  { %s245_s16 = sshll.u32 %s2533_s11, 4  ;;  %s267_s7 = sshll.u32 %s3037_s21, 4  ;;  %s246_s16 = int_to_ptr.vmem [resolvable:$true] %s245_s16  ;;  %s268_s7 = int_to_ptr.hbm [resolvable:$true] %s267_s7 }
  0x39   :  { %248 = dma.hbm_to_vmem [thread:$0]  %s244_s6, 32, %s246_s16, [#allocation27]  }
  0x3a   :  { %s291_s19 = sshll.u32 %s3039_s23, 4  ;;  %s2534_s4 = smov [#allocation29]   ;;  %s292_s19 = int_to_ptr.hbm [resolvable:$true] %s291_s19 }
  0x3b   :  { %s269_s8 = sshll.u32 %s2534_s4, 4  ;;  %s2535_s5 = smov [#allocation32]   ;;  %s270_s8 = int_to_ptr.vmem [resolvable:$true] %s269_s8 }
  0x3c   :  { %272 = dma.hbm_to_vmem [thread:$0]  %s268_s7, 32, %s270_s8, [#allocation30]  }
  0x3d   :  { %s293_s9 = sshll.u32 %s2535_s5, 4  ;;  %s3066_s14 = sld [smem:[#allocation51_spill]]  ;;  %s294_s9 = int_to_ptr.vmem [resolvable:$true] %s293_s9 }
  0x3e   :  { %296 = dma.hbm_to_vmem [thread:$0]  %s292_s19, 64, %s294_s9, [#allocation33]  }
  0x3f   :  { %s3067_s10 = sld [smem:[#allocation55_spill]]  ;;  %s2536_s11 = smov [#allocation2]  }
  0x40   :  { %s54_s23 = sshll.u32 %s2536_s11, 4  ;;  %s2537_s16 = smov [#allocation7]   ;;  %s55_s23 = int_to_ptr.vmem [resolvable:$true] %s54_s23 }
  0x41   :  { %s80_s2 = sshll.u32 %s2537_s16, 4  ;;  %s3068_s28 = sld [smem:[#allocation57_spill]]  ;;  %s81_s2 = int_to_ptr.vmem [resolvable:$true] %s80_s2 }
  0x42   :  { %s3069_s8 = sld [smem:[#allocation60_spill]]  ;;  %s2538_s9 = smov [#allocation10]  }
  0x43   :  { %s52_s18 = sshll.u32 %s3066_s14, 4  ;;  %s102_s3 = sshll.u32 %s2538_s9, 4  ;;  %s53_s18 = int_to_ptr.hbm [resolvable:$true] %s52_s18  ;;  %s103_s3 = int_to_ptr.vmem [resolvable:$true] %s102_s3 }
  0x44   :  { %57 = dma.hbm_to_vmem [thread:$0]  %s53_s18, 128, %s55_s23, [#allocation3]  }
  0x45   :  { %s78_s0 = sshll.u32 %s3067_s10, 4  ;;  %s2539_s30 = smov [#allocation13]   ;;  %s79_s0 = int_to_ptr.hbm [resolvable:$true] %s78_s0 }
  0x46   :  { %83 = dma.hbm_to_vmem [thread:$0]  %s79_s0, 1024, %s81_s2, [#allocation6]  }
  0x47   :  { %s100_s27 = sshll.u32 %s3068_s28, 4  ;;  %s125_s14 = sshll.u32 %s2539_s30, 4  ;;  %s101_s27 = int_to_ptr.hbm [resolvable:$true] %s100_s27  ;;  %s126_s14 = int_to_ptr.vmem [resolvable:$true] %s125_s14 }
  0x48   :  { %s123_s5 = sshll.u32 %s3069_s8, 4  ;;  %s3070_s6 = sld [smem:[#allocation62_spill]]  ;;  %s124_s5 = int_to_ptr.hbm [resolvable:$true] %s123_s5 }
  0x49   :  { %105 = dma.hbm_to_vmem [thread:$0]  %s101_s27, 128, %s103_s3, [#allocation9]  }
  0x4a   :  { %131 = dma.hbm_to_vmem [thread:$0]  %s124_s5, 1664, %s126_s14, [#allocation12], %s2528_s12, %s2528_s12, %s2529_s1  }
  0x4b   :  { %s175_s23 = sshll.u32 %s3029_s13, 4  ;;  %s2540_s16 = smov [#allocation16]   ;;  %s176_s23 = int_to_ptr.hbm [resolvable:$true] %s175_s23 }
  0x4c   :  { %s151_s2 = sshll.u32 %s2540_s16, 4  ;;  %s2541_s29 = smov [#allocation19]   ;;  %s152_s2 = int_to_ptr.vmem [resolvable:$true] %s151_s2 }
  0x4d   :  { %s177_s7 = sshll.u32 %s2541_s29, 4  ;;  %s201_s4 = sshll.u32 %s3031_s15, 4  ;;  %s178_s7 = int_to_ptr.vmem [resolvable:$true] %s177_s7  ;;  %s202_s4 = int_to_ptr.hbm [resolvable:$true] %s201_s4 }
  0x4e   :  { %s149_s10 = sshll.u32 %s3070_s6, 4  ;;  %s227_s8 = sshll.u32 %s3033_s17, 4  ;;  %s150_s10 = int_to_ptr.hbm [resolvable:$true] %s149_s10  ;;  %s228_s8 = int_to_ptr.hbm [resolvable:$true] %s227_s8 }
  0x4f   :  { %157 = dma.hbm_to_vmem [thread:$0]  %s150_s10, 2048, %s152_s2, [#allocation15], %s2528_s12, %s2528_s12, %s2529_s1  }
  0x50   :  { %183 = dma.hbm_to_vmem [thread:$0]  %s176_s23, 256, %s178_s7, [#allocation18], %s2528_s12, %s2528_s12, %s2529_s1  }
  0x51   :  { %s2542_s5 = smov [#allocation22]   ;;  %s2543_s3 = smov [#allocation25]  }
  0x52   :  { %s203_s9 = sshll.u32 %s2542_s5, 4  ;;  %s229_s15 = sshll.u32 %s2543_s3, 4  ;;  %s204_s9 = int_to_ptr.vmem [resolvable:$true] %s203_s9  ;;  %s230_s15 = int_to_ptr.vmem [resolvable:$true] %s229_s15 }
  0x53   :  { %209 = dma.hbm_to_vmem [thread:$0]  %s202_s4, 512, %s204_s9, [#allocation21], %s2528_s12, %s2528_s12, %s2529_s1  }
  0x54   :  { %s2544_s30 = smov 256   ;;  %s2545_s14 = smov 16  }
  0x55   :  { %235 = dma.hbm_to_vmem [thread:$0]  %s228_s8, 32768, %s230_s15, [#allocation24], %s2544_s30, %s2544_s30, %s2545_s14  }
  0x56   :  { %s253_s6 = sshll.u32 %s3036_s20, 4  ;;  %s2546_s17 = smov [#allocation28]   ;;  %s254_s6 = int_to_ptr.hbm [resolvable:$true] %s253_s6 }
  0x57   :  { %s255_s10 = sshll.u32 %s2546_s17, 4  ;;  %s277_s23 = sshll.u32 %s3038_s22, 4  ;;  %s256_s10 = int_to_ptr.vmem [resolvable:$true] %s255_s10  ;;  %s278_s23 = int_to_ptr.hbm [resolvable:$true] %s277_s23 }
  0x58   :  { %261 = dma.hbm_to_vmem [thread:$0]  %s254_s6, 2048, %s256_s10, [#allocation27], %s2528_s12, %s2528_s12, %s2529_s1  }
  0x59   :  { %s2547_s16 = smov [#allocation31]   ;;  %s301_s28 = sshll.u32 %s3040_s24, 4  ;;  %s302_s28 = int_to_ptr.hbm [resolvable:$true] %s301_s28 }
  0x5a   :  { %s279_s2 = sshll.u32 %s2547_s16, 4  ;;  %s314_s22 = sshll.u32 %s3041_s25, 4  ;;  %s280_s2 = int_to_ptr.vmem [resolvable:$true] %s279_s2  ;;  %s315_s22 = int_to_ptr.hbm [resolvable:$true] %s314_s22 }
  0x5b   :  { %285 = dma.hbm_to_vmem [thread:$0]  %s278_s23, 1024, %s280_s2, [#allocation30], %s2528_s12, %s2528_s12, %s2529_s1  }
  0x5c   :  { %s2548_s4 = smov [#allocation34]   ;;  %s2549_s19 = smov [#allocation35]  }
  0x5d   :  { %s303_s13 = sshll.u32 %s2548_s4, 4  ;;  %s316_s24 = sshll.u32 %s2549_s19, 4  ;;  %s304_s13 = int_to_ptr.vmem [resolvable:$true] %s303_s13  ;;  %s317_s24 = int_to_ptr.vmem [resolvable:$true] %s316_s24 }
  0x5e   :  { %309 = dma.hbm_to_vmem [thread:$0]  %s302_s28, 512, %s304_s13, [#allocation33], %s2528_s12, %s2528_s12, %s2529_s1  }
  0x5f   :  { %322 = dma.hbm_to_vmem [thread:$0]  %s315_s22, 4096, %s317_s24, [#allocation36], %s2528_s12, %s2528_s12, %s2529_s1  }
  0x60   :  { %2498 = dma.done.wait [#allocation3], 128  }
  0x61   :  { %2499 = vsyncadd [#allocation3], 4294967168 }
  0x62   :  { %2500 = dma.done.wait [#allocation6], 1152  }
  0x63   :  { %2501 = vsyncadd [#allocation6], 4294966144 }
  0x64   :  { %2502 = dma.done.wait [#allocation9], 256  }
  0x65   :  { %2503 = vsyncadd [#allocation9], 4294967040 }
  0x66   :  { %2504 = dma.done.wait [#allocation12], 1792  }
  0x67   :  { %2505 = vsyncadd [#allocation12], 4294965504 }
  0x68   :  { %2506 = dma.done.wait [#allocation15], 3072  }
  0x69   :  { %2507 = vsyncadd [#allocation15], 4294964224 }
  0x6a   :  { %2508 = dma.done.wait [#allocation18], 1280  }
  0x6b   :  { %2509 = vsyncadd [#allocation18], 4294966016 }
  0x6c   :  { %2510 = dma.done.wait [#allocation21], 1536  }
  0x6d   :  { %2511 = vsyncadd [#allocation21], 4294965760 }
  0x6e   :  { %2512 = dma.done.wait [#allocation24], 33024  }
  0x6f   :  { %2513 = vsyncadd [#allocation24], 4294934272 }
  0x70   :  { %2514 = dma.done.wait [#allocation27], 2080  }
  0x71   :  { %2515 = vsyncadd [#allocation27], 4294965216 }
  0x72   :  { %2516 = dma.done.wait [#allocation30], 1056  }
  0x73   :  { %2517 = vsyncadd [#allocation30], 4294966240 }
  0x74   :  { %2518 = dma.done.wait [#allocation33], 576  }
  0x75   :  { %2519 = vsyncadd [#allocation33], 4294966720 }
  0x76   :  { %2520 = dma.done.wait [#allocation36], 4096  }
  0x77   :  { %2521 = vsyncadd [#allocation36], 4294963200  ;;  %v423_v0 = vld [vmem:[#allocation14 + $0x38] sm:$0xff]  ;;  %v422_v1 = vld [vmem:[#allocation14 + $0x30] sm:$0xff]  ;;  %vm425_vm0 = vcmask 523264   ;;  %v1324_v25 = vlaneseq  ;;  %vm537_vm1 = vcmask 1043456  }
  0x78   :  { %437 = vmatpush.msra.mxu2 %v423_v0  ;;  %v421_v2 = vld [vmem:[#allocation14 + $0x28] sm:$0xff]  ;;  %v465_v3 = vld [vmem:[#allocation16 + $0x78] sm:$0xff]  ;;  %v464_v4 = vld [vmem:[#allocation16 + $0x70] sm:$0xff]  ;;  %vm533_vm3 = vcmask 818176   ;;  %s3071_s5 = sld [smem:[#allocation54_spill]]  ;;  %vm567_vm4 = vcmask 64512  }
  0x79   :  { %v420_v5 = vld [vmem:[#allocation14 + $0x20] sm:$0xff]  ;;  %467 = vmatpush.msra.mxu1 %v465_v3  ;;  %v463_v6 = vld [vmem:[#allocation16 + $0x68] sm:$0xff]  ;;  %v419_v7 = vld [vmem:[#allocation14 + $0x18] sm:$0xff]  ;;  %v2805_v29 = vshrl.u32 %v1324_v25, 7  ;;  %s3072_s15 = sld [smem:[#allocation53_spill]]  ;;  %vm683_vm5 = vcmask 130048  }
  0x7a   :  { %438 = vmatpush.msra.mxu2 %v422_v1  ;;  %v462_v8 = vld [vmem:[#allocation16 + $0x60] sm:$0xff]  ;;  %v418_v9 = vld [vmem:[#allocation14 + $0x10] sm:$0xff]  ;;  %v461_v10 = vld [vmem:[#allocation16 + $0x58] sm:$0xff]  ;;  %s3073_s10 = sld [smem:[#allocation64_spill]]  ;;  %s2552_s20 = smov [#allocation37]  }
  0x7b   :  { %468 = vmatpush.msra.mxu1 %v464_v4  ;;  %v417_v11 = vld [vmem:[#allocation14 + $0x8] sm:$0xff]  ;;  %v460_v12 = vld [vmem:[#allocation16 + $0x50] sm:$0xff]  ;;  %v416_v13 = vld [vmem:[#allocation14] sm:$0xff]  ;;  %1921 = vset.pattern.permute.xlu1 %v2805_v29  ;;  %v2815_v45 = vadd.s32 8, %v2805_v29  ;;  %s3074_s16 = sld [smem:[#allocation59_spill]]  ;;  %s1832_s27 = sshll.u32 %s2552_s20, 4  ;;  %s1833_s27 = int_to_ptr.vmem [resolvable:$true] %s1832_s27 }
  0x7c   :  { %439 = vmatpush.msra.mxu2 %v421_v2  ;;  %v415_v14 = vld [vmem:[#allocation5] sm:$0xff]  ;;  %v459_v15 = vld [vmem:[#allocation16 + $0x48] sm:$0xff]  ;;  %v458_v16 = vld [vmem:[#allocation16 + $0x40] sm:$0xff]  ;;  %1922 = vset.pattern.permute.xlu2 %v2805_v29  ;;  %s3075_s7 = sld [smem:[#allocation66_spill]] }
  0x7d   :  { %469 = vmatpush.msra.mxu1 %v463_v6  ;;  %v457_v17 = vld [vmem:[#allocation16 + $0x38] sm:$0xff]  ;;  %v456_v18 = vld [vmem:[#allocation16 + $0x30] sm:$0xff]  ;;  %v455_v19 = vld [vmem:[#allocation16 + $0x28] sm:$0xff]  ;;  %1920 = vset.pattern.permute.xlu0 %v2805_v29  ;;  %s3076_s19 = sld [smem:[#allocation65_spill]] }
  0x7e   :  { %440 = vmatpush.msra.mxu2 %v420_v5  ;;  %v454_v20 = vld [vmem:[#allocation16 + $0x20] sm:$0xff]  ;;  %v453_v21 = vld [vmem:[#allocation16 + $0x18] sm:$0xff]  ;;  %v452_v22 = vld [vmem:[#allocation16 + $0x10] sm:$0xff] }
  0x7f   :  { %470 = vmatpush.msra.mxu1 %v462_v8  ;;  %v451_v23 = vld [vmem:[#allocation16 + $0x8] sm:$0xff]  ;;  %v450_v24 = vld [vmem:[#allocation16] sm:$0xff]  ;;  %v501_v26 = vld [vmem:[#allocation13 + $0x60] sm:$0xf] }
  0x80   :  { %441 = vmatpush.msra.mxu2 %v419_v7  ;;  %v2801_v27 = vld [vmem:[#allocation11] sm:$0xff]  ;;  %1861 = vmatpush.msk.msra.mxu3 %vm537_vm1, %v501_v26  ;;  %v1322_v30 = vld [vmem:[#allocation8] sm:$0xff]  ;;  %v499_v31 = vld [vmem:[#allocation13 + $0x50] sm:$0xff] }
  0x81   :  { %471 = vmatpush.msra.mxu1 %v461_v10  ;;  %v500_v28 = vld [vmem:[#allocation13 + $0x58] sm:$0xff]  ;;  %vm1321_vm2 = vcmp.gt.s32.totalorder %v2801_v27, 0  ;;  %v509_v32 = vld [vmem:[#allocation17 + $0x38] sm:$0xff]  ;;  %v498_v34 = vld [vmem:[#allocation13 + $0x48] sm:$0xff] }
  0x82   :  { %442 = vmatpush.msra.mxu2 %v418_v9  ;;  %545 = vmatpush.msra.mxu3 %v500_v28  ;;  %v508_v33 = vld [vmem:[#allocation17 + $0x30] sm:$0xff]  ;;  %v507_v35 = vld [vmem:[#allocation17 + $0x28] sm:$0xff]  ;;  %v2810_v36 = vsel %vm1321_vm2, %v1322_v30, 4294967295  ;;  %v497_v37 = vld [vmem:[#allocation13 + $0x40] sm:$0xff] }
  0x83   :  { %472 = vmatpush.msra.mxu1 %v460_v12  ;;  %v506_v38 = vld [vmem:[#allocation17 + $0x20] sm:$0xff]  ;;  %v1339_v39 = vperm.slane %v2810_v36, 1  ;;  %v496_v40 = vld [vmem:[#allocation13 + $0x38] sm:$0xff]  ;;  %v505_v41 = vld [vmem:[#allocation17 + $0x18] sm:$0xff]  ;;  %v1352_v56 = vperm.slane %v2810_v36, 2  ;;  %v1365_v61 = vperm.slane %v2810_v36, 3 }
  0x84   :  { %443 = vmatpush.msra.mxu2 %v417_v11  ;;  %546 = vmatpush.msra.mxu3 %v499_v31  ;;  %v495_v42 = vld [vmem:[#allocation13 + $0x30] sm:$0xff]  ;;  %v494_v43 = vld [vmem:[#allocation13 + $0x28] sm:$0xff]  ;;  %v493_v44 = vld [vmem:[#allocation13 + $0x20] sm:$0xff]  ;;  %v1326_v0 = vperm.slane %v2810_v36, 0  ;;  %v1378_v5 = vperm.slane %v2810_v36, 4  ;;  %v1391_v11 = vperm.slane %v2810_v36, 5 }
  0x85   :  { %473 = vmatpush.msra.mxu1 %v459_v15  ;;  %1344 = vperm.xlu1 %1921, %v1339_v39   ;;  %v492_v46 = vld [vmem:[#allocation13 + $0x18] sm:$0xff]  ;;  %v491_v53 = vld [vmem:[#allocation13 + $0x10] sm:$0xff]  ;;  %v490_v55 = vld [vmem:[#allocation13 + $0x8] sm:$0xff]  ;;  %v1404_v26 = vperm.slane %v2810_v36, 6  ;;  %v1417_v30 = vperm.slane %v2810_v36, 7  ;;  %s1834_s24 = sshll.u32 %s3076_s19, 4  ;;  %s1835_s24 = int_to_ptr.hbm [resolvable:$true] %s1834_s24 }
  0x86   :  { %444 = vmatpush.msra.mxu2 %v416_v13  ;;  %547 = vmatpush.msra.mxu3 %v498_v34  ;;  %v2821_v47 = vld [vmem:[%s3042_s26] sm:$0xff]  ;;  %v503_v54 = vld [vmem:[#allocation17 + $0x8] sm:$0xff]  ;;  %v502_v57 = vld [vmem:[#allocation17] sm:$0xff] }
  0x87   :  { %1859 = vmatmul.msk.f32.vlgmr.msra.gmra.mxu2 %vm425_vm0, %v415_v14  ;;  %474 = vmatpush.msra.mxu1 %v458_v16  ;;  %v424_v48 = vperm.slane %v2821_v47, 0  ;;  %v504_v52 = vld [vmem:[#allocation17 + $0x10] sm:$0xff]  ;;  %v489_v58 = vld [vmem:[#allocation13] sm:$0xff]  ;;  %v563_v60 = vld [vmem:[#allocation19] sm:$0xff]  ;;  %v466_v12 = vperm.slane %v2821_v47, 1 }
  0x88   :  { %521 = vmatpush.msrb.mxu2 %v509_v32  ;;  %548 = vmatpush.msra.mxu3 %v497_v37  ;;  %v488_v59 = vld [vmem:[#allocation2] sm:$0xff]  ;;  %v564_v62 = vld [vmem:[#allocation19 + $0x8] sm:$0xff]  ;;  %v743_v2 = vld [vmem:[#allocation25 + $0xe0] sm:$0xff] }
  0x89   :  { %475 = vmatpush.msra.mxu1 %v457_v17  ;;  %1357 = vperm.xlu2 %1922, %v1352_v56   ;;  %v566_v63 = vld [vmem:[%s3071_s5] sm:$0xff]  ;;  %v739_v4 = vld [vmem:[#allocation25 + $0xc0] sm:$0xff] }
  0x8a   :  { %522 = vmatpush.msrb.mxu2 %v508_v33  ;;  %549 = vmatpush.msra.mxu3 %v496_v40  ;;  %v745_v1 = vld [vmem:[#allocation25 + $0xf0] sm:$0xff]  ;;  %v735_v7 = vld [vmem:[#allocation25 + $0xa0] sm:$0xff] }
  0x8b   :  { %476 = vmatpush.msra.mxu1 %v456_v18  ;;  %586 = vmatpush.msra.mxu0 %v564_v62  ;;  %v741_v3 = vld [vmem:[#allocation25 + $0xd0] sm:$0xff]  ;;  %v731_v9 = vld [vmem:[#allocation25 + $0x80] sm:$0xff]  ;;  %v722_v62 = vld [vmem:[#allocation25 + $0x38] sm:$0xff] }
  0x8c   :  { %523 = vmatpush.msrb.mxu2 %v507_v35  ;;  %550 = vmatpush.msra.mxu3 %v495_v42  ;;  %v737_v6 = vld [vmem:[#allocation25 + $0xb0] sm:$0xff]  ;;  %v727_v13 = vld [vmem:[#allocation25 + $0x60] sm:$0xff] }
  0x8d   :  { %477 = vmatpush.msra.mxu1 %v455_v19  ;;  %1923 = vset.pattern.permute.xlu1 %v2815_v45  ;;  %v733_v8 = vld [vmem:[#allocation25 + $0x90] sm:$0xff]  ;;  %v723_v17 = vld [vmem:[#allocation25 + $0x40] sm:$0xff] }
  0x8e   :  { %524 = vmatpush.msrb.mxu2 %v506_v38  ;;  %551 = vmatpush.msra.mxu3 %v494_v43  ;;  %v729_v10 = vld [vmem:[#allocation25 + $0x70] sm:$0xff]  ;;  %v2845_v28 = vld [vmem:[#allocation7] sm:$0xff] }
  0x8f   :  { %478 = vmatpush.msra.mxu1 %v454_v20  ;;  %1863 = vmatmul.msk.f32.vlgmr.msra.gmra.mxu0 %vm567_vm4, %v566_v63  ;;  %v725_v14 = vld [vmem:[#allocation25 + $0x50] sm:$0xff]  ;;  %v719_v20 = vld [vmem:[#allocation25 + $0x20] sm:$0xff]  ;;  %v720_v63 = vld [vmem:[#allocation25 + $0x28] sm:$0xff] }
  0x90   :  { %525 = vmatpush.msrb.mxu2 %v505_v41  ;;  %552 = vmatpush.msra.mxu3 %v493_v44  ;;  %v721_v19 = vld [vmem:[#allocation25 + $0x30] sm:$0xff]  ;;  %v871_v31 = vld [vmem:[#allocation25 + $0x4e0] sm:$0xff] }
  0x91   :  { %479 = vmatpush.msra.mxu1 %v453_v21  ;;  %1925 = vset.pattern.permute.xlu2 %v2815_v45  ;;  %v717_v21 = vld [vmem:[#allocation25 + $0x10] sm:$0xff]  ;;  %v867_v32 = vld [vmem:[#allocation25 + $0x4c0] sm:$0xff] }
  0x92   :  { %553 = vmatpush.msra.mxu3 %v492_v46  ;;  %526 = vmatpush.msrb.mxu2 %v504_v52  ;;  %v865_v33 = vld [vmem:[#allocation25 + $0x4b0] sm:$0xff]  ;;  %v863_v34 = vld [vmem:[#allocation25 + $0x4a0] sm:$0xff]  ;;  %v746_v46 = vld [vmem:[#allocation25 + $0xf8] sm:$0xff] }
  0x93   :  { %480 = vmatpush.msra.mxu1 %v452_v22  ;;  %1331 = vperm.xlu0 %1920, %v1326_v0   ;;  %v715_v22 = vld [vmem:[#allocation25] sm:$0xff]  ;;  %v861_v35 = vld [vmem:[#allocation25 + $0x490] sm:$0xff]  ;;  %v736_v52 = vld [vmem:[#allocation25 + $0xa8] sm:$0xff] }
  0x94   :  { %554 = vmatpush.msra.mxu3 %v491_v53  ;;  %527 = vmatpush.msrb.mxu2 %v503_v54  ;;  %v859_v36 = vld [vmem:[#allocation25 + $0x480] sm:$0xff]  ;;  %v857_v37 = vld [vmem:[#allocation25 + $0x470] sm:$0xff]  ;;  %v734_v53 = vld [vmem:[#allocation25 + $0x98] sm:$0xff] }
  0x95   :  { %481 = vmatpush.msra.mxu1 %v451_v23  ;;  %1350 = vperm.xlu1 %1923, %v1339_v39   ;;  %v565_v23 = vld [vmem:[%s3072_s15] sm:$0xff]  ;;  %v855_v38 = vld [vmem:[#allocation25 + $0x460] sm:$0xff]  ;;  %v732_v54 = vld [vmem:[#allocation25 + $0x88] sm:$0xff] }
  0x96   :  { %555 = vmatpush.msra.mxu3 %v490_v55  ;;  %528 = vmatpush.msrb.mxu2 %v502_v57  ;;  %v853_v39 = vld [vmem:[#allocation25 + $0x450] sm:$0xff]  ;;  %v851_v40 = vld [vmem:[#allocation25 + $0x440] sm:$0xff]  ;;  %v730_v55 = vld [vmem:[#allocation25 + $0x78] sm:$0xff] }
  0x97   :  { %482 = vmatpush.msra.mxu1 %v450_v24  ;;  %v873_v24 = vld [vmem:[#allocation25 + $0x4f0] sm:$0xff]  ;;  %v847_v42 = vld [vmem:[#allocation25 + $0x420] sm:$0xff]  ;;  %v726_v57 = vld [vmem:[#allocation25 + $0x58] sm:$0xff] }
  0x98   :  { %556 = vmatpush.msra.mxu3 %v489_v58  ;;  %609 = vmatpush.msra.mxu2 %v563_v60  ;;  %v849_v41 = vld [vmem:[#allocation25 + $0x430] sm:$0xff]  ;;  %v843_v44 = vld [vmem:[#allocation25 + $0x400] sm:$0xff]  ;;  %v1319_v58 = vld [vmem:[#allocation10] sm:$0xff]  ;;  %v1318_v60 = vcvt.s32.f32 %v2801_v27 }
  0x99   :  { %1862 = vmatmul.msk.f32.vlgmr.msra.gmra.mxu3 %vm533_vm3, %v488_v59  ;;  %977 = vmatpush.msrb.mxu1 %v745_v1  ;;  %v845_v43 = vld [vmem:[#allocation25 + $0x410] sm:$0xff]  ;;  %v724_v59 = vld [vmem:[#allocation25 + $0x48] sm:$0xff]  ;;  %v718_v1 = vld [vmem:[#allocation25 + $0x18] sm:$0xff] }
  0x9a   :  { %1363 = vperm.xlu2 %1925, %v1352_v56   ;;  %v728_v56 = vld [vmem:[#allocation25 + $0x68] sm:$0xff] }
  0x9b   :  { %978 = vmatpush.msrb.mxu1 %v743_v2  ;;  %1383 = vperm.xlu0 %1920, %v1378_v5   ;;  %v716_v2 = vld [vmem:[#allocation25 + $0x8] sm:$0xff] }
  0x9d   :  { %1924 = vset.pattern.permute.xlu1 %v2805_v29  ;;  %979 = vmatpush.msrb.mxu1 %v741_v3  ;;  %v874_v3 = vld [vmem:[#allocation25 + $0x4f8] sm:$0xff] }
  0x9f   :  { %980 = vmatpush.msrb.mxu1 %v739_v4 }
  0xa1   :  { %981 = vmatpush.msrb.mxu1 %v737_v6  ;;  %v870_v6 = vld [vmem:[#allocation25 + $0x4d8] sm:$0xff] }
  0xa2   :  { %1376 = vperm.xlu2 %1925, %v1365_v61  }
  0xa3   :  { %982 = vmatpush.msrb.mxu1 %v735_v7  ;;  %1926 = vset.pattern.permute.xlu0 %v2815_v45  ;;  %v868_v7 = vld [vmem:[#allocation25 + $0x4c8] sm:$0xff] }
  0xa5   :  { %1370 = vperm.xlu1 %1924, %v1365_v61   ;;  %983 = vmatpush.msrb.mxu1 %v733_v8  ;;  %v1320_v61 = vcvt.s32.f32 %v1319_v58  ;;  %v866_v8 = vld [vmem:[#allocation25 + $0x4b8] sm:$0xff] }
  0xa7   :  { %984 = vmatpush.msrb.mxu1 %v731_v9  ;;  %v864_v9 = vld [vmem:[#allocation25 + $0x4a8] sm:$0xff] }
  0xa9   :  { %985 = vmatpush.msrb.mxu1 %v729_v10  ;;  %v862_v10 = vld [vmem:[#allocation25 + $0x498] sm:$0xff] }
  0xaa   :  { %1928 = vset.pattern.permute.xlu2 %v2805_v29 }
  0xab   :  { %986 = vmatpush.msrb.mxu1 %v727_v13  ;;  %1337 = vperm.xlu0 %1926, %v1326_v0   ;;  %v1553_v0 = vmul.f32 %v1320_v61, %v1318_v60 }
  0xad   :  { %1927 = vset.pattern.permute.xlu1 %v2815_v45  ;;  %987 = vmatpush.msrb.mxu1 %v725_v14  ;;  %v1554_v4 = vsel %vm683_vm5, %v1553_v0, 0.0 }
  0xaf   :  { %988 = vmatpush.msrb.mxu1 %v723_v17  ;;  %v860_v17 = vld [vmem:[#allocation25 + $0x488] sm:$0xff] }
  0xb1   :  { %989 = vmatpush.msrb.mxu1 %v721_v19  ;;  %v858_v19 = vld [vmem:[#allocation25 + $0x478] sm:$0xff] }
  0xb2   :  { %1396 = vperm.xlu2 %1928, %v1391_v11  }
  0xb3   :  { %990 = vmatpush.msrb.mxu1 %v719_v20  ;;  %1415 = vperm.xlu0 %1926, %v1404_v26   ;;  %v622_v20 = vld [vmem:[#allocation20 + $0x28] sm:$0xff] }
  0xb5   :  { %1389 = vperm.xlu1 %1927, %v1378_v5   ;;  %991 = vmatpush.msrb.mxu1 %v717_v21  ;;  %v872_v5 = vld [vmem:[#allocation25 + $0x4e8] sm:$0xff] }
  0xb6   :  { %v856_v21 = vld [vmem:[#allocation25 + $0x468] sm:$0xff] }
  0xb7   :  { %992 = vmatpush.msrb.mxu1 %v715_v22  ;;  %v2551_v22 = vmov 0.0  }
  0xba   :  { %1409 = vperm.xlu2 %1928, %v1404_v26  }
  0xbd   :  { %1402 = vperm.xlu1 %1927, %v1391_v11  }
  0xc2   :  { %1930 = vset.pattern.permute.xlu2 %v2815_v45  ;;  %v742_v45 = vld [vmem:[#allocation25 + $0xd8] sm:$0xff] }
  0xc5   :  { %1929 = vset.pattern.permute.xlu1 %v2805_v29  ;;  %v869_v29 = vld [vmem:[#allocation25 + $0x4d0] sm:$0xff] }
  0xca   :  { %1428 = vperm.xlu2 %1930, %v1417_v30  }
  0xcd   :  { %1422 = vperm.xlu1 %1929, %v1417_v30  }
  0xe3   :  { %v1358_v11 = vpop.permute.xlu2 %1357 }
  0xf3   :  { %1555 = vadd.xlane.f32.xlu2 %v1554_v4 }
  0xf4   :  { %v1364_v13 = vpop.permute.xlu2 %1363 }
  0xfc   :  { %v1377_v30 = vpop.permute.xlu2 %1376 }
 0x105   :  { %v2868_v26 = vpop.permute.xlu0 %1331 }
 0x10a   :  { %v446_v49 = vpop.f32.mrf.mxu2 }
 0x10b   :  { %v447_v50 = vadd.f32 %v446_v49, %v424_v48  ;;  %v744_v48 = vld [vmem:[#allocation25 + $0xe8] sm:$0xff]  ;;  %v2851_v49 = vld [vmem:[#allocation7 + $0x20] sm:$0xff] }
 0x10d   :  { %v449_v51 = vmax.f32 %v447_v50, 0.0  ;;  %v740_v50 = vld [vmem:[#allocation25 + $0xc8] sm:$0xff] }
 0x10f   :  { %483 = vmatmul.f32.vlgmr.msra.gmra.mxu1 %v449_v51  ;;  %v738_v51 = vld [vmem:[#allocation25 + $0xb8] sm:$0xff] }
 0x110   :  { %1057 = vmatpush.msra.mxu1 %v873_v24 }
 0x112   :  { %1058 = vmatpush.msra.mxu1 %v871_v31  ;;  %v854_v31 = vld [vmem:[#allocation25 + $0x458] sm:$0xff] }
 0x114   :  { %1059 = vmatpush.msra.mxu1 %v869_v29 }
 0x116   :  { %1060 = vmatpush.msra.mxu1 %v867_v32 }
 0x117   :  { %993 = vmatmul.f32.vlgmr.msrb.gmra.mxu1 %v2845_v28 }
 0x118   :  { %1061 = vmatpush.msra.mxu1 %v865_v33 }
 0x11a   :  { %1062 = vmatpush.msra.mxu1 %v863_v34  ;;  %v620_v34 = vld [vmem:[#allocation20 + $0x18] sm:$0xff] }
 0x11c   :  { %1063 = vmatpush.msra.mxu1 %v861_v35 }
 0x11e   :  { %1064 = vmatpush.msra.mxu1 %v859_v36  ;;  %v852_v36 = vld [vmem:[#allocation25 + $0x448] sm:$0xff] }
 0x120   :  { %1065 = vmatpush.msra.mxu1 %v857_v37 }
 0x122   :  { %1066 = vmatpush.msra.mxu1 %v855_v38 }
 0x124   :  { %1067 = vmatpush.msra.mxu1 %v853_v39 }
 0x126   :  { %1068 = vmatpush.msra.mxu1 %v851_v40  ;;  %v619_v40 = vld [vmem:[#allocation20 + $0x10] sm:$0xff] }
 0x128   :  { %1069 = vmatpush.msra.mxu1 %v849_v41  ;;  %v850_v41 = vld [vmem:[#allocation25 + $0x438] sm:$0xff] }
 0x12a   :  { %1070 = vmatpush.msra.mxu1 %v847_v42  ;;  %v618_v42 = vld [vmem:[#allocation20 + $0x8] sm:$0xff] }
 0x12c   :  { %1071 = vmatpush.msra.mxu1 %v845_v43 }
 0x12e   :  { %1072 = vmatpush.msra.mxu1 %v843_v44 }
 0x12f   :  { %1073 = vmatmul.f32.vlgmr.msra.gmra.mxu1 %v2851_v49 }
 0x130   :  { %1137 = vmatpush.msrb.mxu1 %v746_v46  ;;  %v848_v46 = vld [vmem:[#allocation25 + $0x428] sm:$0xff] }
 0x132   :  { %1138 = vmatpush.msrb.mxu1 %v744_v48 }
 0x134   :  { %1139 = vmatpush.msrb.mxu1 %v742_v45  ;;  %v1384_v45 = vpop.permute.xlu0 %1383 }
 0x136   :  { %1140 = vmatpush.msrb.mxu1 %v740_v50  ;;  %v617_v50 = vld [vmem:[#allocation20] sm:$0xff] }
 0x138   :  { %1141 = vmatpush.msrb.mxu1 %v738_v51  ;;  %v1397_v51 = vpop.permute.xlu2 %1396 }
 0x13a   :  { %1142 = vmatpush.msrb.mxu1 %v736_v52 }
 0x13c   :  { %1143 = vmatpush.msrb.mxu1 %v734_v53  ;;  %v846_v53 = vld [vmem:[#allocation25 + $0x418] sm:$0xff] }
 0x13e   :  { %1144 = vmatpush.msrb.mxu1 %v732_v54 }
 0x140   :  { %1145 = vmatpush.msrb.mxu1 %v730_v55  ;;  %v844_v55 = vld [vmem:[#allocation25 + $0x408] sm:$0xff] }
 0x142   :  { %1146 = vmatpush.msrb.mxu1 %v728_v56  ;;  %v1549_v56 = vld [vmem:[#allocation28 + $0x78] sm:$0xff] }
 0x144   :  { %1147 = vmatpush.msrb.mxu1 %v726_v57 }
 0x146   :  { %1148 = vmatpush.msrb.mxu1 %v724_v59 }
 0x148   :  { %1149 = vmatpush.msrb.mxu1 %v722_v62 }
 0x14a   :  { %1150 = vmatpush.msrb.mxu1 %v720_v63  ;;  %v1548_v63 = vld [vmem:[#allocation28 + $0x70] sm:$0xff] }
 0x14c   :  { %1151 = vmatpush.msrb.mxu1 %v718_v1  ;;  %v1547_v1 = vld [vmem:[#allocation28 + $0x68] sm:$0xff] }
 0x14e   :  { %1152 = vmatpush.msrb.mxu1 %v716_v2  ;;  %v1550_v2 = vsel %vm683_vm5, %v1318_v60, 0.0  ;;  %v1545_v60 = vld [vmem:[#allocation28 + $0x58] sm:$0xff] }
 0x14f   :  { %1153 = vmatmul.f32.vlgmr.msrb.gmra.mxu1 %v2845_v28  ;;  %v621_v28 = vld [vmem:[#allocation20 + $0x20] sm:$0xff]  ;;  %1551 = vadd.xlane.f32.xlu1 %v1550_v2 }
 0x150   :  { %1217 = vmatpush.msra.mxu1 %v874_v3 }
 0x152   :  { %1218 = vmatpush.msra.mxu1 %v872_v5 }
 0x154   :  { %1219 = vmatpush.msra.mxu1 %v870_v6 }
 0x156   :  { %1220 = vmatpush.msra.mxu1 %v868_v7 }
 0x158   :  { %1221 = vmatpush.msra.mxu1 %v866_v8  ;;  %v1338_v8 = vpop.permute.xlu0 %1337 }
 0x15a   :  { %1222 = vmatpush.msra.mxu1 %v864_v9  ;;  %v1410_v9 = vpop.permute.xlu2 %1409 }
 0x15c   :  { %1223 = vmatpush.msra.mxu1 %v862_v10  ;;  %v1546_v10 = vld [vmem:[#allocation28 + $0x60] sm:$0xff] }
 0x15e   :  { %1224 = vmatpush.msra.mxu1 %v860_v17 }
 0x160   :  { %1225 = vmatpush.msra.mxu1 %v858_v19 }
 0x162   :  { %1226 = vmatpush.msra.mxu1 %v856_v21 }
 0x164   :  { %1227 = vmatpush.msra.mxu1 %v854_v31 }
 0x166   :  { %1228 = vmatpush.msra.mxu1 %v852_v36  ;;  %v1542_v36 = vld [vmem:[#allocation28 + $0x40] sm:$0xff] }
 0x168   :  { %1229 = vmatpush.msra.mxu1 %v850_v41 }
 0x16a   :  { %1230 = vmatpush.msra.mxu1 %v848_v46 }
 0x16c   :  { %1231 = vmatpush.msra.mxu1 %v846_v53 }
 0x16e   :  { %1232 = vmatpush.msra.mxu1 %v844_v55 }
 0x16f   :  { %1233 = vmatmul.f32.vlgmr.msra.gmra.mxu1 %v2851_v49 }
 0x170   :  { %1584 = vmatpush.msrb.mxu1 %v1549_v56  ;;  %v1540_v56 = vld [vmem:[#allocation28 + $0x30] sm:$0xff] }
 0x172   :  { %1585 = vmatpush.msrb.mxu1 %v1548_v63 }
 0x174   :  { %1586 = vmatpush.msrb.mxu1 %v1547_v1  ;;  %v1539_v1 = vld [vmem:[#allocation28 + $0x28] sm:$0xff] }
 0x176   :  { %1587 = vmatpush.msrb.mxu1 %v1546_v10 }
 0x178   :  { %1588 = vmatpush.msrb.mxu1 %v1545_v60  ;;  %v1537_v60 = vld [vmem:[#allocation28 + $0x18] sm:$0xff] }
 0x18c   :  { %v484_v15 = vpop.f32.mrf.mxu1 }
 0x18d   :  { %v485_v16 = vadd.f32 %v484_v15, %v466_v12  ;;  %v1345_v12 = vpop.permute.xlu1 %1344  ;;  %v2860_v15 = vand.u32 127, %v1324_v25  ;;  %v2550_v25 = vmov 0  }
 0x18e   :  { %1931 = vset.pattern.permute.xlu2 %v2550_v25  ;;  %1932 = vset.pattern.permute.xlu1 %v2550_v25 }
 0x18f   :  { %v487_v18 = vmax.f32 %v485_v16, 0.0  ;;  %v624_v16 = vld [vmem:[#allocation20 + $0x38] sm:$0xff]  ;;  %vm1432_vm6 = vcmp.eq.s32.totalorder %v1345_v12, %v2860_v15  ;;  %vm1434_vm8 = vcmp.eq.s32.totalorder %v1358_v11, %v2860_v15  ;;  %vm1435_vm9 = vcmp.eq.s32.totalorder %v1364_v13, %v2860_v15  ;;  %1933 = vset.pattern.permute.xlu0 %v2550_v25  ;;  %v414_v25 = vld [vmem:[%s3042_s26 + $0x8] sm:$0x3] }
 0x190   :  { %637 = vmatpush.msrb.mxu0 %v624_v16  ;;  %v1872_v29 = vsel %vm1434_vm8, 1.0, %v2551_v22  ;;  %v1873_v32 = vsel %vm1435_vm9, 1.0, %v2551_v22  ;;  %vm1437_vm10 = vcmp.eq.s32.totalorder %v1377_v30, %v2860_v15  ;;  %vm1438_vm12 = vcmp.eq.s32.totalorder %v1384_v45, %v2860_v15 }
 0x191   :  { %1860 = vmatmul.msk.f32.vlgmr.msrb.gmra.mxu2 %vm425_vm0, %v487_v18  ;;  %v623_v18 = vld [vmem:[#allocation20 + $0x30] sm:$0xff]  ;;  %v1492_v37 = vadd.f32 %v1873_v32, %v1872_v29  ;;  %v1875_v38 = vsel %vm1437_vm10, 1.0, %v2551_v22  ;;  %v1876_v54 = vsel %vm1438_vm12, 1.0, %v2551_v22  ;;  %vm1430_vm14 = vcmp.eq.s32.totalorder %v2868_v26, %v2860_v15 }
 0x192   :  { %638 = vmatpush.msrb.mxu0 %v623_v18  ;;  %vm1440_vm15 = vcmp.eq.s32.totalorder %v1397_v51, %v2860_v15  ;;  %v1868_v6 = vsel %vm1430_vm14, 1.0, %v2551_v22  ;;  %vm1431_vm2 = vcmp.eq.s32.totalorder %v1338_v8, %v2860_v15  ;;  %vm1569_vm9 = vcmask 1041409   ;;  %v588_v8 = vpop.f32.mrf.mxu0 }
 0x193   :  { %v1493_v48 = vrot.slane %v1492_v37, 4  ;;  %v1878_v11 = vsel %vm1440_vm15, 1.0, %v2551_v22  ;;  %v1869_v27 = vsel %vm1431_vm2, 1.0, %v2551_v22  ;;  %vm1571_vm10 = vcmask 1042434  }
 0x194   :  { %639 = vmatpush.msrb.mxu0 %v622_v20  ;;  %v1544_v20 = vld [vmem:[#allocation28 + $0x50] sm:$0xff]  ;;  %vm1575_vm12 = vcmask 1044484   ;;  %vm1579_vm14 = vcmask 1046534   ;;  %vm1581_vm15 = vcmask 1047559   ;;  %vm655_vm2 = vcmask 261120  }
 0x195   :  { %v1351_v14 = vpop.permute.xlu1 %1350  ;;  %v1494_v61 = vadd.f32 %v1493_v48, %v1492_v37  ;;  %1589 = vmatpush.msrb.mxu1 %v1544_v20  ;;  %v558_v37 = vpop.f32.mrf.mxu3 }
 0x196   :  { %vm1433_vm7 = vcmp.eq.s32.totalorder %v1351_v14, %v2860_v15  ;;  %640 = vmatpush.msrb.mxu0 %v621_v28  ;;  %v1478_v14 = vadd.f32 %v1869_v27, %v1868_v6 }
 0x197   :  { %v1871_v24 = vsel %vm1433_vm7, 1.0, %v2551_v22  ;;  %v1495_v5 = vrot.slane %v1494_v61, 2 }
 0x198   :  { %641 = vmatpush.msrb.mxu0 %v620_v34  ;;  %v1479_v21 = vrot.slane %v1478_v14, 4  ;;  %v1416_v34 = vpop.permute.xlu0 %1415 }
 0x199   :  { %1864 = vmatmul.msk.f32.vlgmr.msra.gmra.mxu2 %vm567_vm4, %v565_v23  ;;  %v1870_v23 = vsel %vm1432_vm6, 1.0, %v2551_v22  ;;  %v1496_v17 = vadd.f32 %v1495_v5, %v1494_v61  ;;  %vm1442_vm4 = vcmp.eq.s32.totalorder %v1410_v9, %v2860_v15  ;;  %vm1443_vm6 = vcmp.eq.s32.totalorder %v1416_v34, %v2860_v15  ;;  %v653_v34 = vld [vmem:[#allocation22 + $0x18] sm:$0xff] }
 0x19a   :  { %v1485_v35 = vadd.f32 %v1871_v24, %v1870_v23  ;;  %642 = vmatpush.msrb.mxu0 %v619_v40  ;;  %v1543_v24 = vld [vmem:[#allocation28 + $0x48] sm:$0xff]  ;;  %v1480_v30 = vadd.f32 %v1479_v21, %v1478_v14  ;;  %v1880_v32 = vsel %vm1442_vm4, 1.0, %v2551_v22  ;;  %671 = vmatpush.msrb.mxu2 %v653_v34  ;;  %v899_v34 = vld [vmem:[#allocation25 + $0x5c0] sm:$0xff] }
 0x19b   :  { %v1497_v31 = vrot.slane %v1496_v17, 1  ;;  %1590 = vmatpush.msrb.mxu1 %v1543_v24  ;;  %v1535_v24 = vld [vmem:[#allocation28 + $0x8] sm:$0xff] }
 0x19c   :  { %v1486_v43 = vrot.slane %v1485_v35, 4  ;;  %643 = vmatpush.msrb.mxu0 %v618_v42  ;;  %v1881_v42 = vsel %vm1443_vm6, 1.0, %v2551_v22 }
 0x19d   :  { %v1371_v33 = vpop.permute.xlu1 %1370  ;;  %1591 = vmatpush.msrb.mxu1 %v1542_v36  ;;  %v651_v36 = vld [vmem:[#allocation22 + $0x8] sm:$0xff] }
 0x19e   :  { %vm1436_vm11 = vcmp.eq.s32.totalorder %v1371_v33, %v2860_v15  ;;  %644 = vmatpush.msrb.mxu0 %v617_v50  ;;  %v1487_v57 = vadd.f32 %v1486_v43, %v1485_v35  ;;  %v1429_v35 = vpop.permute.xlu2 %1428  ;;  %v1520_v50 = vadd.f32 %v1881_v42, %v1880_v32  ;;  %v803_v42 = vld [vmem:[#allocation25 + $0x2c0] sm:$0xff] }
 0x19f   :  { %v1874_v39 = vsel %vm1436_vm11, 1.0, %v2551_v22  ;;  %vm1445_vm7 = vcmp.eq.s32.totalorder %v1429_v35, %v2860_v15  ;;  %vm1573_vm11 = vcmask 1043459   ;;  %v652_v35 = vld [vmem:[#allocation22 + $0x10] sm:$0xff] }
 0x1a0   :  { %v1499_v44 = vadd.f32 %v1875_v38, %v1874_v39  ;;  %v1488_v3 = vrot.slane %v1487_v57, 2  ;;  %v561_v38 = vperm.slane %v414_v25, 0  ;;  %v1481_v39 = vrot.slane %v1480_v30, 2  ;;  %672 = vmatpush.msrb.mxu2 %v652_v35  ;;  %v2915_v35 = vld [vmem:[#allocation7 + $0x8] sm:$0xff] }
 0x1a1   :  { %v1883_v43 = vsel %vm1445_vm7, 1.0, %v2551_v22  ;;  %v1521_v61 = vrot.slane %v1520_v50, 4 }
 0x1a2   :  { %v1500_v58 = vrot.slane %v1499_v44, 4  ;;  %v1489_v12 = vadd.f32 %v1488_v3, %v1487_v57  ;;  %v1482_v45 = vadd.f32 %v1481_v39, %v1480_v30  ;;  %v1498_v57 = vadd.f32 %v1497_v31, %v1496_v17  ;;  %v1534_v31 = vld [vmem:[#allocation28] sm:$0xff]  ;;  %v650_v39 = vld [vmem:[#allocation22] sm:$0xff]  ;;  %673 = vmatpush.msrb.mxu2 %v651_v36  ;;  %v806_v36 = vld [vmem:[#allocation25 + $0x2d8] sm:$0xff] }
 0x1a4   :  { %v1501_v4 = vadd.f32 %v1500_v58, %v1499_v44  ;;  %v1490_v26 = vrot.slane %v1489_v12, 1  ;;  %v1541_v44 = vld [vmem:[#allocation28 + $0x38] sm:$0xff]  ;;  %674 = vmatpush.msrb.mxu2 %v650_v39 }
 0x1a5   :  { %v1390_v52 = vpop.permute.xlu1 %1389  ;;  %1592 = vmatpush.msrb.mxu1 %v1541_v44  ;;  %v801_v44 = vld [vmem:[#allocation25 + $0x2b0] sm:$0xff]  ;;  %v895_v39 = vld [vmem:[#allocation25 + $0x5a0] sm:$0xff] }
 0x1a6   :  { %vm1439_vm13 = vcmp.eq.s32.totalorder %v1390_v52, %v2860_v15  ;;  %v1502_v13 = vrot.slane %v1501_v4, 2  ;;  %v1491_v58 = vadd.f32 %v1490_v26, %v1489_v12 }
 0x1a7   :  { %v1877_v59 = vsel %vm1439_vm13, 1.0, %v2551_v22  ;;  %1593 = vmatpush.msrb.mxu1 %v1540_v56  ;;  %vm1577_vm13 = vcmask 1045509   ;;  %v791_v56 = vld [vmem:[#allocation25 + $0x260] sm:$0xff] }
 0x1a8   :  { %v1506_v62 = vadd.f32 %v1877_v59, %v1876_v54  ;;  %v1503_v28 = vadd.f32 %v1502_v13, %v1501_v4  ;;  %v1483_v59 = vrot.slane %v1482_v45, 1  ;;  %v1522_v4 = vadd.f32 %v1521_v61, %v1520_v50  ;;  %v797_v50 = vld [vmem:[#allocation25 + $0x290] sm:$0xff]  ;;  %v787_v61 = vld [vmem:[#allocation25 + $0x240] sm:$0xff] }
 0x1a9   :  { %1594 = vmatpush.msrb.mxu1 %v1539_v1  ;;  %v753_v1 = vld [vmem:[#allocation25 + $0x130] sm:$0xff] }
 0x1aa   :  { %v1507_v0 = vrot.slane %v1506_v62, 4  ;;  %v1504_v48 = vrot.slane %v1503_v28, 1  ;;  %v1484_v3 = vadd.f32 %v1483_v59, %v1482_v45  ;;  %v1523_v10 = vrot.slane %v1522_v4, 2  ;;  %v771_v45 = vld [vmem:[#allocation25 + $0x1c0] sm:$0xff]  ;;  %v761_v59 = vld [vmem:[#allocation25 + $0x170] sm:$0xff] }
 0x1ac   :  { %v1508_v7 = vadd.f32 %v1507_v0, %v1506_v62  ;;  %v1505_v2 = vadd.f32 %v1504_v48, %v1503_v28  ;;  %v1570_v9 = vsel %vm1569_vm9, %v1491_v58, %v1484_v3  ;;  %v1524_v14 = vadd.f32 %v1523_v10, %v1522_v4  ;;  %v799_v48 = vld [vmem:[#allocation25 + $0x2a0] sm:$0xff]  ;;  %v789_v58 = vld [vmem:[#allocation25 + $0x250] sm:$0xff] }
 0x1ad   :  { %v1403_v49 = vpop.permute.xlu1 %1402  ;;  %v1572_v12 = vsel %vm1571_vm10, %v1498_v57, %v1570_v9  ;;  %v763_v57 = vld [vmem:[#allocation25 + $0x180] sm:$0xff]  ;;  %v785_v3 = vld [vmem:[#allocation25 + $0x230] sm:$0xff] }
 0x1ae   :  { %vm1441_vm3 = vcmp.eq.s32.totalorder %v1403_v49, %v2860_v15  ;;  %v1509_v18 = vrot.slane %v1508_v7, 2  ;;  %v1525_v21 = vrot.slane %v1524_v14, 1  ;;  %v749_v4 = vld [vmem:[#allocation25 + $0x110] sm:$0xff]  ;;  %v935_v10 = vld [vmem:[#allocation25 + $0x6e0] sm:$0xff] }
 0x1af   :  { %v1879_v16 = vsel %vm1441_vm3, 1.0, %v2551_v22  ;;  %v937_v9 = vld [vmem:[#allocation25 + $0x6f0] sm:$0xff]  ;;  %vm1676_vm3 = vcmask 0  }
 0x1b0   :  { %v1513_v19 = vadd.f32 %v1879_v16, %v1878_v11  ;;  %v1510_v29 = vadd.f32 %v1509_v18, %v1508_v7  ;;  %v1538_v7 = vld [vmem:[#allocation28 + $0x20] sm:$0xff]  ;;  %v614_v11 = vperm.slane %v2821_v47, 2  ;;  %v1574_v16 = vsel %vm1573_vm11, %v1505_v2, %v1572_v12 }
 0x1b1   :  { %1595 = vmatpush.msrb.mxu1 %v1538_v7  ;;  %v1526_v28 = vadd.f32 %v1525_v21, %v1524_v14  ;;  %v751_v2 = vld [vmem:[#allocation25 + $0x120] sm:$0xff]  ;;  %v781_v7 = vld [vmem:[#allocation25 + $0x210] sm:$0xff] }
 0x1b2   :  { %v1514_v23 = vrot.slane %v1513_v19, 4  ;;  %v1511_v53 = vrot.slane %v1510_v29, 1  ;;  %v927_v12 = vld [vmem:[#allocation25 + $0x6a0] sm:$0xff]  ;;  %v913_v21 = vld [vmem:[#allocation25 + $0x630] sm:$0xff] }
 0x1b3   :  { %1596 = vmatpush.msrb.mxu1 %v1537_v60  ;;  %v929_v60 = vld [vmem:[#allocation25 + $0x6b0] sm:$0xff]  ;;  %v923_v14 = vld [vmem:[#allocation25 + $0x680] sm:$0xff] }
 0x1b4   :  { %v1515_v33 = vadd.f32 %v1514_v23, %v1513_v19  ;;  %v1512_v5 = vadd.f32 %v1511_v53, %v1510_v29  ;;  %v1536_v19 = vld [vmem:[#allocation28 + $0x10] sm:$0xff]  ;;  %v767_v53 = vld [vmem:[#allocation25 + $0x1a0] sm:$0xff] }
 0x1b5   :  { %v1423_v40 = vpop.permute.xlu1 %1422  ;;  %1597 = vmatpush.msrb.mxu1 %v1536_v19  ;;  %v625_v19 = vperm.slane %v2821_v47, 3  ;;  %v810_v47 = vld [vmem:[#allocation25 + $0x2f8] sm:$0xff] }
 0x1b6   :  { %v1516_v41 = vrot.slane %v1515_v33, 2  ;;  %vm1444_vm8 = vcmp.eq.s32.totalorder %v1423_v40, %v2860_v15  ;;  %v1576_v20 = vsel %vm1575_vm12, %v1512_v5, %v1574_v16  ;;  %v805_v40 = vld [vmem:[#allocation25 + $0x2d0] sm:$0xff]  ;;  %v783_v5 = vld [vmem:[#allocation25 + $0x220] sm:$0xff] }
 0x1b7   :  { %v1882_v51 = vsel %vm1444_vm8, 1.0, %v2551_v22  ;;  %1598 = vmatpush.msrb.mxu1 %v1535_v24  ;;  %v921_v16 = vld [vmem:[#allocation25 + $0x670] sm:$0xff]  ;;  %v911_v24 = vld [vmem:[#allocation25 + $0x620] sm:$0xff] }
 0x1b8   :  { %v1517_v54 = vadd.f32 %v1516_v41, %v1515_v33  ;;  %v1527_v55 = vadd.f32 %v1883_v43, %v1882_v51  ;;  %v777_v41 = vld [vmem:[#allocation25 + $0x1f0] sm:$0xff]  ;;  %v775_v43 = vld [vmem:[#allocation25 + $0x1e0] sm:$0xff] }
 0x1b9   :  { %1599 = vmatpush.msrb.mxu1 %v1534_v31  ;;  %997 = vmatpush.msra.mxu2 %v777_v41  ;;  %v769_v51 = vld [vmem:[#allocation25 + $0x1b0] sm:$0xff]  ;;  %v903_v31 = vld [vmem:[#allocation25 + $0x5e0] sm:$0xff] }
 0x1ba   :  { %v1518_v63 = vrot.slane %v1517_v54, 1  ;;  %v1528_v0 = vrot.slane %v1527_v55, 4  ;;  %v893_v41 = vld [vmem:[#allocation25 + $0x590] sm:$0xff] }
 0x1bb   :  { %998 = vmatpush.msra.mxu2 %v775_v43  ;;  %v891_v43 = vld [vmem:[#allocation25 + $0x580] sm:$0xff] }
 0x1bc   :  { %v1529_v6 = vadd.f32 %v1528_v0, %v1527_v55  ;;  %v1519_v49 = vadd.f32 %v1518_v63, %v1517_v54  ;;  %v793_v54 = vld [vmem:[#allocation25 + $0x270] sm:$0xff]  ;;  %v755_v0 = vld [vmem:[#allocation25 + $0x140] sm:$0xff] }
 0x1bd   :  { %v765_v55 = vld [vmem:[#allocation25 + $0x190] sm:$0xff] }
 0x1be   :  { %v1530_v27 = vrot.slane %v1529_v6, 2  ;;  %v1578_v26 = vsel %vm1577_vm13, %v1519_v49, %v1576_v20  ;;  %v757_v63 = vld [vmem:[#allocation25 + $0x150] sm:$0xff]  ;;  %v931_v49 = vld [vmem:[#allocation25 + $0x6c0] sm:$0xff] }
 0x1bf   :  { %v1580_v32 = vsel %vm1579_vm14, %v1526_v28, %v1578_v26  ;;  %v915_v20 = vld [vmem:[#allocation25 + $0x640] sm:$0xff]  ;;  %v905_v28 = vld [vmem:[#allocation25 + $0x5f0] sm:$0xff] }
 0x1c0   :  { %v1531_v18 = vadd.f32 %v1530_v27, %v1529_v6  ;;  %v747_v6 = vld [vmem:[#allocation25 + $0x100] sm:$0xff]  ;;  %v2910_v27 = vld [vmem:[#allocation7 + $0x10] sm:$0xff] }
 0x1c2   :  { %v1532_v23 = vrot.slane %v1531_v18, 1 }
 0x1c4   :  { %v1533_v29 = vadd.f32 %v1532_v23, %v1531_v18  ;;  %v917_v18 = vld [vmem:[#allocation25 + $0x650] sm:$0xff] }
 0x1c6   :  { %v1582_v33 = vsel %vm1581_vm15, %v1533_v29, %v1580_v32  ;;  %v907_v29 = vld [vmem:[#allocation25 + $0x600] sm:$0xff]  ;;  %v901_v32 = vld [vmem:[#allocation25 + $0x5d0] sm:$0xff] }
 0x1c7   :  { %1600 = vmatmul.f32.vlgmr.msrb.gmra.mxu1 %v1582_v33  ;;  %v808_v33 = vld [vmem:[#allocation25 + $0x2e8] sm:$0xff] }
 0x214   :  { %v530_v46 = vpop.f32.mrf.mxu2 }
 0x215   :  { %v559_v52 = vadd.f32 %v558_v37, %v530_v46  ;;  %v809_v37 = vld [vmem:[#allocation25 + $0x2f0] sm:$0xff] }
 0x216   :  { %1017 = vmatpush.msrb.mxu3 %v809_v37  ;;  %v773_v46 = vld [vmem:[#allocation25 + $0x1d0] sm:$0xff] }
 0x217   :  { %v562_v62 = vadd.f32 %v561_v38, %v559_v52  ;;  %v807_v38 = vld [vmem:[#allocation25 + $0x2e0] sm:$0xff]  ;;  %999 = vmatpush.msra.mxu2 %v773_v46  ;;  %v897_v37 = vld [vmem:[#allocation25 + $0x5b0] sm:$0xff] }
 0x218   :  { %1018 = vmatpush.msrb.mxu3 %v807_v38  ;;  %v795_v52 = vld [vmem:[#allocation25 + $0x280] sm:$0xff]  ;;  %v804_v38 = vld [vmem:[#allocation25 + $0x2c8] sm:$0xff]  ;;  %v889_v46 = vld [vmem:[#allocation25 + $0x570] sm:$0xff] }
 0x219   :  { %1302 = vperm.xlu2 %1931, %v562_v62   ;;  %1000 = vmatpush.msra.mxu2 %v771_v45  ;;  %v759_v62 = vld [vmem:[#allocation25 + $0x160] sm:$0xff] }
 0x21a   :  { %1019 = vmatpush.msrb.mxu3 %v805_v40  ;;  %v802_v40 = vld [vmem:[#allocation25 + $0x2b8] sm:$0xff]  ;;  %v887_v45 = vld [vmem:[#allocation25 + $0x560] sm:$0xff] }
 0x21b   :  { %1001 = vmatpush.msra.mxu2 %v769_v51  ;;  %v885_v51 = vld [vmem:[#allocation25 + $0x550] sm:$0xff] }
 0x21c   :  { %v611_v13 = vpop.f32.mrf.mxu2  ;;  %1020 = vmatpush.msrb.mxu3 %v803_v42  ;;  %v800_v42 = vld [vmem:[#allocation25 + $0x2a8] sm:$0xff] }
 0x21d   :  { %v612_v17 = vadd.f32 %v611_v13, %v588_v8  ;;  %1002 = vmatpush.msra.mxu2 %v767_v53  ;;  %v779_v8 = vld [vmem:[#allocation25 + $0x200] sm:$0xff]  ;;  %v925_v13 = vld [vmem:[#allocation25 + $0x690] sm:$0xff] }
 0x21e   :  { %1021 = vmatpush.msrb.mxu3 %v801_v44  ;;  %v798_v44 = vld [vmem:[#allocation25 + $0x298] sm:$0xff]  ;;  %v883_v53 = vld [vmem:[#allocation25 + $0x540] sm:$0xff] }
 0x21f   :  { %v615_v25 = vadd.f32 %v614_v11, %v612_v17  ;;  %1003 = vmatpush.msra.mxu2 %v765_v55  ;;  %v933_v11 = vld [vmem:[#allocation25 + $0x6d0] sm:$0xff]  ;;  %v919_v17 = vld [vmem:[#allocation25 + $0x660] sm:$0xff] }
 0x220   :  { %1022 = vmatpush.msrb.mxu3 %v799_v48  ;;  %v796_v48 = vld [vmem:[#allocation25 + $0x288] sm:$0xff]  ;;  %v881_v55 = vld [vmem:[#allocation25 + $0x530] sm:$0xff] }
 0x221   :  { %v616_v30 = vmax.f32 %v615_v25, 0.0  ;;  %1004 = vmatpush.msra.mxu2 %v763_v57  ;;  %v879_v57 = vld [vmem:[#allocation25 + $0x520] sm:$0xff] }
 0x222   :  { %1023 = vmatpush.msrb.mxu3 %v797_v50  ;;  %v794_v50 = vld [vmem:[#allocation25 + $0x278] sm:$0xff] }
 0x223   :  { %1865 = vmatmul.msk.f32.vlgmr.msrb.gmra.mxu0 %vm425_vm0, %v616_v30  ;;  %1005 = vmatpush.msra.mxu2 %v761_v59  ;;  %v909_v30 = vld [vmem:[#allocation25 + $0x610] sm:$0xff]  ;;  %v786_v59 = vld [vmem:[#allocation25 + $0x238] sm:$0xff] }
 0x224   :  { %1024 = vmatpush.msrb.mxu3 %v795_v52  ;;  %v792_v52 = vld [vmem:[#allocation25 + $0x268] sm:$0xff] }
 0x225   :  { %1006 = vmatpush.msra.mxu2 %v759_v62  ;;  %v784_v62 = vld [vmem:[#allocation25 + $0x228] sm:$0xff] }
 0x226   :  { %1025 = vmatpush.msrb.mxu3 %v793_v54  ;;  %v790_v54 = vld [vmem:[#allocation25 + $0x258] sm:$0xff] }
 0x227   :  { %1007 = vmatpush.msra.mxu2 %v757_v63  ;;  %v875_v63 = vld [vmem:[#allocation25 + $0x500] sm:$0xff] }
 0x228   :  { %1026 = vmatpush.msrb.mxu3 %v791_v56  ;;  %v788_v56 = vld [vmem:[#allocation25 + $0x248] sm:$0xff] }
 0x229   :  { %1008 = vmatpush.msra.mxu2 %v755_v0  ;;  %v778_v0 = vld [vmem:[#allocation25 + $0x1f8] sm:$0xff] }
 0x22a   :  { %1027 = vmatpush.msrb.mxu3 %v789_v58  ;;  %v2918_v58 = vld [vmem:[#allocation7 + $0x30] sm:$0xff] }
 0x22b   :  { %1009 = vmatpush.msra.mxu2 %v753_v1  ;;  %v782_v1 = vld [vmem:[#allocation25 + $0x218] sm:$0xff] }
 0x22c   :  { %1028 = vmatpush.msrb.mxu3 %v787_v61  ;;  %v877_v61 = vld [vmem:[#allocation25 + $0x510] sm:$0xff] }
 0x22d   :  { %1010 = vmatpush.msra.mxu2 %v751_v2  ;;  %v2921_v2 = vld [vmem:[#allocation7 + $0x28] sm:$0xff] }
 0x22e   :  { %1029 = vmatpush.msrb.mxu3 %v785_v3  ;;  %v776_v3 = vld [vmem:[#allocation25 + $0x1e8] sm:$0xff] }
 0x22f   :  { %1011 = vmatpush.msra.mxu2 %v749_v4  ;;  %v780_v4 = vld [vmem:[#allocation25 + $0x208] sm:$0xff] }
 0x230   :  { %1030 = vmatpush.msrb.mxu3 %v783_v5  ;;  %v774_v5 = vld [vmem:[#allocation25 + $0x1d8] sm:$0xff] }
 0x231   :  { %1012 = vmatpush.msra.mxu2 %v747_v6  ;;  %v772_v6 = vld [vmem:[#allocation25 + $0x1c8] sm:$0xff] }
 0x232   :  { %1031 = vmatpush.msrb.mxu3 %v781_v7  ;;  %v770_v7 = vld [vmem:[#allocation25 + $0x1b8] sm:$0xff] }
 0x234   :  { %1032 = vmatpush.msrb.mxu3 %v779_v8  ;;  %v768_v8 = vld [vmem:[#allocation25 + $0x1a8] sm:$0xff] }
 0x235   :  { %1033 = vmatmul.f32.vlgmr.msrb.gmra.mxu3 %v2910_v27 }
 0x236   :  { %1097 = vmatpush.msra.mxu3 %v937_v9  ;;  %v766_v9 = vld [vmem:[#allocation25 + $0x198] sm:$0xff] }
 0x238   :  { %1098 = vmatpush.msra.mxu3 %v935_v10  ;;  %v764_v10 = vld [vmem:[#allocation25 + $0x188] sm:$0xff] }
 0x23a   :  { %1099 = vmatpush.msra.mxu3 %v933_v11  ;;  %v762_v11 = vld [vmem:[#allocation25 + $0x178] sm:$0xff] }
 0x23c   :  { %1100 = vmatpush.msra.mxu3 %v931_v49  ;;  %v760_v49 = vld [vmem:[#allocation25 + $0x168] sm:$0xff] }
 0x23e   :  { %1101 = vmatpush.msra.mxu3 %v929_v60  ;;  %v758_v60 = vld [vmem:[#allocation25 + $0x158] sm:$0xff] }
 0x240   :  { %1102 = vmatpush.msra.mxu3 %v927_v12  ;;  %v756_v12 = vld [vmem:[#allocation25 + $0x148] sm:$0xff] }
 0x242   :  { %1103 = vmatpush.msra.mxu3 %v925_v13  ;;  %v754_v13 = vld [vmem:[#allocation25 + $0x138] sm:$0xff] }
 0x244   :  { %1104 = vmatpush.msra.mxu3 %v923_v14  ;;  %v2925_v14 = vpop.f32.mrf.mxu1 }
 0x246   :  { %1105 = vmatpush.msra.mxu3 %v921_v16  ;;  %v750_v16 = vld [vmem:[#allocation25 + $0x118] sm:$0xff] }
 0x248   :  { %1106 = vmatpush.msra.mxu3 %v919_v17  ;;  %v748_v17 = vld [vmem:[#allocation25 + $0x108] sm:$0xff] }
 0x24a   :  { %1107 = vmatpush.msra.mxu3 %v917_v18  ;;  %v906_v18 = vld [vmem:[#allocation25 + $0x5f8] sm:$0xff] }
 0x24c   :  { %1108 = vmatpush.msra.mxu3 %v915_v20  ;;  %v902_v20 = vld [vmem:[#allocation25 + $0x5d8] sm:$0xff] }
 0x24e   :  { %1109 = vmatpush.msra.mxu3 %v913_v21  ;;  %v2928_v21 = vpop.f32.mrf.mxu1 }
 0x250   :  { %1110 = vmatpush.msra.mxu3 %v911_v24  ;;  %v896_v24 = vld [vmem:[#allocation25 + $0x5a8] sm:$0xff] }
 0x252   :  { %1111 = vmatpush.msra.mxu3 %v909_v30  ;;  %v680_v30 = vld [vmem:[#allocation23] sm:$0xff] }
 0x254   :  { %1112 = vmatpush.msra.mxu3 %v907_v29  ;;  %v892_v29 = vld [vmem:[#allocation25 + $0x588] sm:$0xff] }
 0x255   :  { %1113 = vmatmul.f32.vlgmr.msra.gmra.mxu3 %v2918_v58 }
 0x256   :  { %1177 = vmatpush.msrb.mxu3 %v810_v47  ;;  %v839_v47 = vld [vmem:[#allocation25 + $0x3e0] sm:$0xff] }
 0x258   :  { %1178 = vmatpush.msrb.mxu3 %v808_v33  ;;  %v890_v33 = vld [vmem:[#allocation25 + $0x578] sm:$0xff] }
 0x25a   :  { %1179 = vmatpush.msrb.mxu3 %v806_v36  ;;  %v888_v36 = vld [vmem:[#allocation25 + $0x568] sm:$0xff] }
 0x25c   :  { %1180 = vmatpush.msrb.mxu3 %v804_v38  ;;  %v886_v38 = vld [vmem:[#allocation25 + $0x558] sm:$0xff] }
 0x25e   :  { %1181 = vmatpush.msrb.mxu3 %v802_v40  ;;  %v884_v40 = vld [vmem:[#allocation25 + $0x548] sm:$0xff] }
 0x260   :  { %1182 = vmatpush.msrb.mxu3 %v800_v42  ;;  %v882_v42 = vld [vmem:[#allocation25 + $0x538] sm:$0xff] }
 0x262   :  { %1183 = vmatpush.msrb.mxu3 %v798_v44 }
 0x264   :  { %1184 = vmatpush.msrb.mxu3 %v796_v48  ;;  %v825_v48 = vld [vmem:[#allocation25 + $0x370] sm:$0xff] }
 0x266   :  { %1185 = vmatpush.msrb.mxu3 %v794_v50  ;;  %v1552_v50 = vpop.xlane.xlu1 %1551 }
 0x268   :  { %1186 = vmatpush.msrb.mxu3 %v792_v52  ;;  %v823_v52 = vld [vmem:[#allocation25 + $0x360] sm:$0xff] }
 0x26a   :  { %1187 = vmatpush.msrb.mxu3 %v790_v54  ;;  %v876_v54 = vld [vmem:[#allocation25 + $0x508] sm:$0xff] }
 0x26c   :  { %1188 = vmatpush.msrb.mxu3 %v788_v56 }
 0x26e   :  { %1189 = vmatpush.msrb.mxu3 %v786_v59  ;;  %v821_v59 = vld [vmem:[#allocation25 + $0x350] sm:$0xff] }
 0x270   :  { %1190 = vmatpush.msrb.mxu3 %v784_v62  ;;  %v819_v62 = vld [vmem:[#allocation25 + $0x340] sm:$0xff] }
 0x272   :  { %1191 = vmatpush.msrb.mxu3 %v782_v1 }
 0x274   :  { %1192 = vmatpush.msrb.mxu3 %v780_v4  ;;  %v817_v4 = vld [vmem:[#allocation25 + $0x330] sm:$0xff] }
 0x275   :  { %1193 = vmatmul.f32.vlgmr.msrb.gmra.mxu3 %v2910_v27  ;;  %v752_v27 = vld [vmem:[#allocation25 + $0x128] sm:$0xff] }
 0x2a0   :  { %v646_v25 = vpop.f32.mrf.mxu0 }
 0x2a1   :  { %v647_v23 = vadd.f32 %v646_v25, %v625_v19  ;;  %v904_v19 = vld [vmem:[#allocation25 + $0x5e8] sm:$0xff] }
 0x2a2   :  { %v900_v25 = vld [vmem:[#allocation25 + $0x5c8] sm:$0xff] }
 0x2a3   :  { %v649_v26 = vmax.f32 %v647_v23, 0.0  ;;  %v898_v23 = vld [vmem:[#allocation25 + $0x5b8] sm:$0xff] }
 0x2a5   :  { %1866 = vmatmul.msk.f32.vlgmr.msrb.gmra.mxu2 %vm655_vm2, %v649_v26  ;;  %v681_v26 = vld [vmem:[#allocation23 + $0x8] sm:$0xff] }
 0x2a6   :  { %1077 = vmatpush.msrb.mxu2 %v905_v28  ;;  %701 = vmatpush.msra.mxu0 %v681_v26  ;;  %v894_v28 = vld [vmem:[#allocation25 + $0x598] sm:$0xff]  ;;  %v969_v26 = vld [vmem:[#allocation25 + $0x7f0] sm:$0xff] }
 0x2a8   :  { %1078 = vmatpush.msrb.mxu2 %v903_v31  ;;  %v841_v31 = vld [vmem:[#allocation25 + $0x3f0] sm:$0xff]  ;;  %702 = vmatpush.msra.mxu0 %v680_v30  ;;  %v938_v30 = vld [vmem:[#allocation25 + $0x6f8] sm:$0xff] }
 0x2a9   :  { %1257 = vmatpush.msra.mxu3 %v938_v30  ;;  %v968_v30 = vld [vmem:[#allocation25 + $0x7e8] sm:$0xff] }
 0x2aa   :  { %1079 = vmatpush.msrb.mxu2 %v901_v32  ;;  %1037 = vmatpush.msrb.mxu0 %v841_v31  ;;  %v2930_v32 = vpop.f32.mrf.mxu1 }
 0x2ac   :  { %1080 = vmatpush.msrb.mxu2 %v899_v34  ;;  %1038 = vmatpush.msrb.mxu0 %v839_v47  ;;  %v837_v34 = vld [vmem:[#allocation25 + $0x3d0] sm:$0xff]  ;;  %v936_v47 = vld [vmem:[#allocation25 + $0x6e8] sm:$0xff] }
 0x2ad   :  { %1013 = vmatmul.f32.vlgmr.msra.gmra.mxu2 %v2915_v35  ;;  %1258 = vmatpush.msra.mxu3 %v936_v47  ;;  %v958_v47 = vld [vmem:[#allocation25 + $0x798] sm:$0xff] }
 0x2ae   :  { %1081 = vmatpush.msrb.mxu2 %v897_v37  ;;  %1039 = vmatpush.msrb.mxu0 %v837_v34  ;;  %v833_v37 = vld [vmem:[#allocation25 + $0x3b0] sm:$0xff] }
 0x2b0   :  { %1082 = vmatpush.msrb.mxu2 %v895_v39  ;;  %v831_v39 = vld [vmem:[#allocation25 + $0x3a0] sm:$0xff] }
 0x2b2   :  { %1083 = vmatpush.msrb.mxu2 %v893_v41  ;;  %v829_v41 = vld [vmem:[#allocation25 + $0x390] sm:$0xff]  ;;  %v2932_v44 = vpop.f32.mrf.mxu1 }
 0x2b4   :  { %1084 = vmatpush.msrb.mxu2 %v891_v43  ;;  %v827_v43 = vld [vmem:[#allocation25 + $0x380] sm:$0xff] }
 0x2b6   :  { %1085 = vmatpush.msrb.mxu2 %v889_v46  ;;  %v880_v46 = vld [vmem:[#allocation25 + $0x528] sm:$0xff] }
 0x2b8   :  { %1086 = vmatpush.msrb.mxu2 %v887_v45  ;;  %v1558_v45 = vld [vmem:[#allocation29] sm:$0x3] }
 0x2b9   :  { %v1559_v56 = vperm.slane %v1558_v45, 0 }
 0x2ba   :  { %1087 = vmatpush.msrb.mxu2 %v885_v51  ;;  %v878_v51 = vld [vmem:[#allocation25 + $0x518] sm:$0xff] }
 0x2bc   :  { %1088 = vmatpush.msrb.mxu2 %v883_v53  ;;  %v1556_v53 = vpop.xlane.xlu2 %1555 }
 0x2be   :  { %1089 = vmatpush.msrb.mxu2 %v881_v55  ;;  %v1557_v55 = vsub.f32 %v1552_v50, %v1556_v53 }
 0x2c0   :  { %1090 = vmatpush.msrb.mxu2 %v879_v57  ;;  %v1617_v57 = vld [vmem:[#allocation31 + $0x38] sm:$0xff]  ;;  %v1560_v1 = vmul.f32 %v1559_v56, %v1557_v55  ;;  %v945_v56 = vld [vmem:[#allocation25 + $0x730] sm:$0xff] }
 0x2c1   :  { %v918_v55 = vld [vmem:[#allocation25 + $0x658] sm:$0xff] }
 0x2c2   :  { %1091 = vmatpush.msrb.mxu2 %v877_v61  ;;  %v1616_v61 = vld [vmem:[#allocation31 + $0x30] sm:$0xff] }
 0x2c4   :  { %1092 = vmatpush.msrb.mxu2 %v875_v63  ;;  %v1607_v63 = vadd.f32 1e-06, %v1552_v50  ;;  %v951_v50 = vld [vmem:[#allocation25 + $0x760] sm:$0xff] }
 0x2c5   :  { %1093 = vmatmul.f32.vlgmr.msrb.gmra.mxu2 %v2921_v2 }
 0x2c6   :  { %1157 = vmatpush.msra.mxu2 %v778_v0  ;;  %v1604_v0 = vperm.slane %v1558_v45, 1  ;;  %1934 = vrcp.f32 %v1607_v63  ;;  %v924_v45 = vld [vmem:[#allocation25 + $0x688] sm:$0xff] }
 0x2c7   :  { %v912_v63 = vld [vmem:[#allocation25 + $0x628] sm:$0xff] }
 0x2c8   :  { %1158 = vmatpush.msra.mxu2 %v776_v3  ;;  %v1615_v3 = vld [vmem:[#allocation31 + $0x28] sm:$0xff] }
 0x2ca   :  { %1159 = vmatpush.msra.mxu2 %v774_v5  ;;  %v1601_v5 = vpop.f32.mrf.mxu1 }
 0x2cc   :  { %1160 = vmatpush.msra.mxu2 %v772_v6  ;;  %v1614_v6 = vld [vmem:[#allocation31 + $0x20] sm:$0xff] }
 0x2ce   :  { %1161 = vmatpush.msra.mxu2 %v770_v7  ;;  %v1605_v7 = vmul.f32 %v1604_v0, %v1556_v53  ;;  %v920_v53 = vld [vmem:[#allocation25 + $0x668] sm:$0xff]  ;;  %v939_v0 = vld [vmem:[#allocation25 + $0x700] sm:$0xff] }
 0x2d0   :  { %1162 = vmatpush.msra.mxu2 %v768_v8  ;;  %v1602_v8 = vadd.f32 %v1601_v5, %v1560_v1  ;;  %v910_v1 = vld [vmem:[#allocation25 + $0x618] sm:$0xff]  ;;  %v908_v5 = vld [vmem:[#allocation25 + $0x608] sm:$0xff] }
 0x2d2   :  { %1163 = vmatpush.msra.mxu2 %v766_v9  ;;  %v1613_v9 = vld [vmem:[#allocation31 + $0x18] sm:$0xff] }
 0x2d4   :  { %1164 = vmatpush.msra.mxu2 %v764_v10  ;;  %v815_v10 = vld [vmem:[#allocation25 + $0x320] sm:$0xff] }
 0x2d6   :  { %1165 = vmatpush.msra.mxu2 %v762_v11  ;;  %v1612_v11 = vld [vmem:[#allocation31 + $0x10] sm:$0xff] }
 0x2d8   :  { %1166 = vmatpush.msra.mxu2 %v760_v49  ;;  %v813_v49 = vld [vmem:[#allocation25 + $0x310] sm:$0xff] }
 0x2da   :  { %1167 = vmatpush.msra.mxu2 %v758_v60  ;;  %v811_v60 = vld [vmem:[#allocation25 + $0x300] sm:$0xff] }
 0x2dc   :  { %1168 = vmatpush.msra.mxu2 %v756_v12  ;;  %v1611_v12 = vld [vmem:[#allocation31 + $0x8] sm:$0xff] }
 0x2de   :  { %1169 = vmatpush.msra.mxu2 %v754_v13  ;;  %v1935_v13 = vpop.eup %1934 }
 0x2e0   :  { %1170 = vmatpush.msra.mxu2 %v752_v27  ;;  %v1610_v27 = vld [vmem:[#allocation31] sm:$0xff] }
 0x2e2   :  { %1171 = vmatpush.msra.mxu2 %v750_v16 }
 0x2e4   :  { %1172 = vmatpush.msra.mxu2 %v748_v17  ;;  %v2939_v17 = vld [vmem:[%s3042_s26] sm:$0xff] }
 0x2e5   :  { %1173 = vmatmul.f32.vlgmr.msra.gmra.mxu2 %v2915_v35  ;;  %v835_v35 = vld [vmem:[#allocation25 + $0x3c0] sm:$0xff] }
 0x2e6   :  { %1237 = vmatpush.msrb.mxu2 %v906_v18  ;;  %1040 = vmatpush.msrb.mxu0 %v835_v35  ;;  %v654_v18 = vperm.slane %v2939_v17, 4  ;;  %v963_v35 = vld [vmem:[#allocation25 + $0x7c0] sm:$0xff] }
 0x2e8   :  { %1238 = vmatpush.msrb.mxu2 %v904_v19  ;;  %1041 = vmatpush.msrb.mxu0 %v833_v37  ;;  %v2945_v19 = vld [vmem:[%s3073_s10] sm:$0x3]  ;;  %v2952_v37 = vld [vmem:[#allocation7 + $0x18] sm:$0xff] }
 0x2ea   :  { %1239 = vmatpush.msrb.mxu2 %v902_v20  ;;  %1042 = vmatpush.msrb.mxu0 %v831_v39  ;;  %v932_v39 = vld [vmem:[#allocation25 + $0x6c8] sm:$0xff] }
 0x2ec   :  { %1240 = vmatpush.msrb.mxu2 %v900_v25  ;;  %1043 = vmatpush.msrb.mxu0 %v829_v41  ;;  %v957_v41 = vld [vmem:[#allocation25 + $0x790] sm:$0xff] }
 0x2ee   :  { %1241 = vmatpush.msrb.mxu2 %v898_v23  ;;  %1044 = vmatpush.msrb.mxu0 %v827_v43  ;;  %v973_v23 = vperm.slane %v2945_v19, 0  ;;  %v955_v43 = vld [vmem:[#allocation25 + $0x780] sm:$0xff] }
 0x2f0   :  { %1242 = vmatpush.msrb.mxu2 %v896_v24  ;;  %1045 = vmatpush.msrb.mxu0 %v825_v48  ;;  %v995_v31 = vadd.f32 %v2925_v14, %v973_v23  ;;  %v959_v14 = vld [vmem:[#allocation25 + $0x7a0] sm:$0xff]  ;;  %v953_v48 = vld [vmem:[#allocation25 + $0x770] sm:$0xff]  ;;  %v814_v23 = vld [vmem:[#allocation25 + $0x318] sm:$0xff] }
 0x2f2   :  { %1243 = vmatpush.msrb.mxu2 %v894_v28  ;;  %1046 = vmatpush.msrb.mxu0 %v823_v52  ;;  %v967_v28 = vld [vmem:[#allocation25 + $0x7e0] sm:$0xff]  ;;  %v949_v52 = vld [vmem:[#allocation25 + $0x750] sm:$0xff] }
 0x2f4   :  { %1244 = vmatpush.msrb.mxu2 %v892_v29  ;;  %1047 = vmatpush.msrb.mxu0 %v821_v59  ;;  %v965_v29 = vld [vmem:[#allocation25 + $0x7d0] sm:$0xff]  ;;  %v943_v59 = vld [vmem:[#allocation25 + $0x720] sm:$0xff] }
 0x2f6   :  { %1245 = vmatpush.msrb.mxu2 %v890_v33  ;;  %1048 = vmatpush.msrb.mxu0 %v819_v62  ;;  %v941_v62 = vld [vmem:[#allocation25 + $0x710] sm:$0xff] }
 0x2f8   :  { %1246 = vmatpush.msrb.mxu2 %v888_v36  ;;  %1049 = vmatpush.msrb.mxu0 %v817_v4  ;;  %v934_v36 = vld [vmem:[#allocation25 + $0x6d8] sm:$0xff] }
 0x2f9   :  { %1259 = vmatpush.msra.mxu3 %v934_v36  ;;  %v842_v4 = vld [vmem:[#allocation25 + $0x3f8] sm:$0xff]  ;;  %v952_v36 = vld [vmem:[#allocation25 + $0x768] sm:$0xff] }
 0x2fa   :  { %1247 = vmatpush.msrb.mxu2 %v886_v38  ;;  %1050 = vmatpush.msrb.mxu0 %v815_v10  ;;  %v961_v38 = vld [vmem:[#allocation25 + $0x7b0] sm:$0xff]  ;;  %v832_v10 = vld [vmem:[#allocation25 + $0x3a8] sm:$0xff] }
 0x2fb   :  { %1260 = vmatpush.msra.mxu3 %v932_v39  ;;  %v946_v39 = vld [vmem:[#allocation25 + $0x738] sm:$0xff] }
 0x2fc   :  { %1248 = vmatpush.msrb.mxu2 %v884_v40  ;;  %1051 = vmatpush.msrb.mxu0 %v813_v49  ;;  %v930_v40 = vld [vmem:[#allocation25 + $0x6b8] sm:$0xff]  ;;  %v828_v49 = vld [vmem:[#allocation25 + $0x388] sm:$0xff] }
 0x2fd   :  { %1261 = vmatpush.msra.mxu3 %v930_v40  ;;  %v942_v40 = vld [vmem:[#allocation25 + $0x718] sm:$0xff] }
 0x2fe   :  { %1249 = vmatpush.msrb.mxu2 %v882_v42  ;;  %1052 = vmatpush.msrb.mxu0 %v811_v60  ;;  %v928_v42 = vld [vmem:[#allocation25 + $0x6a8] sm:$0xff]  ;;  %v826_v60 = vld [vmem:[#allocation25 + $0x378] sm:$0xff] }
 0x2ff   :  { %1262 = vmatpush.msra.mxu3 %v928_v42 }
 0x300   :  { %1250 = vmatpush.msrb.mxu2 %v880_v46  ;;  %v926_v46 = vld [vmem:[#allocation25 + $0x698] sm:$0xff] }
 0x301   :  { %1263 = vmatpush.msra.mxu3 %v926_v46 }
 0x302   :  { %1251 = vmatpush.msrb.mxu2 %v878_v51  ;;  %v922_v51 = vld [vmem:[#allocation25 + $0x678] sm:$0xff] }
 0x303   :  { %1264 = vmatpush.msra.mxu3 %v924_v45 }
 0x304   :  { %1252 = vmatpush.msrb.mxu2 %v876_v54  ;;  %v947_v54 = vld [vmem:[#allocation25 + $0x740] sm:$0xff] }
 0x305   :  { %1253 = vmatmul.f32.vlgmr.msrb.gmra.mxu2 %v2921_v2  ;;  %v1606_v2 = vadd.f32 %v1605_v7, %v1602_v8  ;;  %1265 = vmatpush.msra.mxu3 %v922_v51  ;;  %v838_v7 = vld [vmem:[#allocation25 + $0x3d8] sm:$0xff]  ;;  %v836_v8 = vld [vmem:[#allocation25 + $0x3c8] sm:$0xff] }
 0x306   :  { %1630 = vmatpush.msra.mxu2 %v1617_v57  ;;  %v916_v57 = vld [vmem:[#allocation25 + $0x648] sm:$0xff] }
 0x307   :  { %v1609_v16 = vmul.f32 %v1935_v13, %v1606_v2  ;;  %1266 = vmatpush.msra.mxu3 %v920_v53  ;;  %v820_v13 = vld [vmem:[#allocation25 + $0x348] sm:$0xff] }
 0x308   :  { %1631 = vmatpush.msra.mxu2 %v1616_v61  ;;  %v914_v61 = vld [vmem:[#allocation25 + $0x638] sm:$0xff] }
 0x309   :  { %1267 = vmatpush.msra.mxu3 %v918_v55 }
 0x30a   :  { %1632 = vmatpush.msra.mxu2 %v1615_v3  ;;  %v2955_v3 = vld [vmem:[#allocation7 + $0x38] sm:$0xff] }
 0x30b   :  { %1268 = vmatpush.msra.mxu3 %v916_v57 }
 0x30c   :  { %1633 = vmatpush.msra.mxu2 %v1614_v6  ;;  %v840_v6 = vld [vmem:[#allocation25 + $0x3e8] sm:$0xff] }
 0x30d   :  { %1269 = vmatpush.msra.mxu3 %v914_v61 }
 0x30e   :  { %1634 = vmatpush.msra.mxu2 %v1613_v9  ;;  %v834_v9 = vld [vmem:[#allocation25 + $0x3b8] sm:$0xff] }
 0x30f   :  { %1270 = vmatpush.msra.mxu3 %v912_v63 }
 0x310   :  { %1635 = vmatpush.msra.mxu2 %v1612_v11  ;;  %v830_v11 = vld [vmem:[#allocation25 + $0x398] sm:$0xff] }
 0x311   :  { %1271 = vmatpush.msra.mxu3 %v910_v1 }
 0x312   :  { %1636 = vmatpush.msra.mxu2 %v1611_v12  ;;  %v824_v12 = vld [vmem:[#allocation25 + $0x368] sm:$0xff] }
 0x313   :  { %1272 = vmatpush.msra.mxu3 %v908_v5 }
 0x314   :  { %1637 = vmatpush.msra.mxu2 %v1610_v27  ;;  %1273 = vmatmul.f32.vlgmr.msra.gmra.mxu3 %v2918_v58  ;;  %v822_v58 = vld [vmem:[#allocation25 + $0x358] sm:$0xff]  ;;  %v974_v27 = vperm.slane %v2945_v19, 1 }
 0x315   :  { %1884 = vmatmul.msk.f32.vlgmr.msra.gmra.mxu2 %vm425_vm0, %v1609_v16  ;;  %v818_v16 = vld [vmem:[#allocation25 + $0x338] sm:$0xff]  ;;  %vm1649_vm0 = vcmask 31744  }
 0x316   :  { %v966_v19 = vld [vmem:[#allocation25 + $0x7d8] sm:$0xff] }
 0x328   :  { %v676_v20 = vpop.f32.mrf.mxu2 }
 0x329   :  { %v677_v25 = vadd.f32 %v676_v20, %v654_v18  ;;  %v816_v18 = vld [vmem:[#allocation25 + $0x328] sm:$0xff]  ;;  %v1155_v20 = vadd.f32 %v2930_v32, %v974_v27  ;;  %v1776_v27 = vld [vmem:[#allocation35 + $0xd0] sm:$0xff] }
 0x32a   :  { %v960_v32 = vld [vmem:[#allocation25 + $0x7a8] sm:$0xff] }
 0x32b   :  { %v679_v24 = vmax.f32 %v677_v25, 0.0 }
 0x32d   :  { %1867 = vmatmul.msk.f32.vlgmr.msra.gmra.mxu0 %vm683_vm5, %v679_v24  ;;  %vm1825_vm5 = vcmask 23552  }
 0x32e   :  { %1117 = vmatpush.msra.mxu0 %v969_v26  ;;  %v812_v26 = vld [vmem:[#allocation25 + $0x308] sm:$0xff] }
 0x330   :  { %1118 = vmatpush.msra.mxu0 %v967_v28  ;;  %v1014_v33 = vpop.f32.mrf.mxu2  ;;  %v970_v28 = vld [vmem:[#allocation25 + $0x7f8] sm:$0xff] }
 0x331   :  { %v2950_v34 = vadd.f32 %v1014_v33, %v995_v31  ;;  %v964_v31 = vld [vmem:[#allocation25 + $0x7c8] sm:$0xff] }
 0x332   :  { %1119 = vmatpush.msra.mxu0 %v965_v29  ;;  %v962_v29 = vld [vmem:[#allocation25 + $0x7b8] sm:$0xff]  ;;  %v956_v33 = vld [vmem:[#allocation25 + $0x788] sm:$0xff] }
 0x334   :  { %1120 = vmatpush.msra.mxu0 %v963_v35  ;;  %v954_v35 = vld [vmem:[#allocation25 + $0x778] sm:$0xff] }
 0x335   :  { %1053 = vmatmul.f32.vlgmr.msrb.gmra.mxu0 %v2952_v37 }
 0x336   :  { %1121 = vmatpush.msra.mxu0 %v961_v38  ;;  %v950_v38 = vld [vmem:[#allocation25 + $0x758] sm:$0xff] }
 0x338   :  { %1122 = vmatpush.msra.mxu0 %v959_v14  ;;  %v944_v14 = vld [vmem:[#allocation25 + $0x728] sm:$0xff] }
 0x33a   :  { %1123 = vmatpush.msra.mxu0 %v957_v41  ;;  %v940_v41 = vld [vmem:[#allocation25 + $0x708] sm:$0xff] }
 0x33c   :  { %1124 = vmatpush.msra.mxu0 %v955_v43  ;;  %v1618_v43 = vperm.slane %v2939_v17, 6 }
 0x33e   :  { %1125 = vmatpush.msra.mxu0 %v953_v48 }
 0x340   :  { %1126 = vmatpush.msra.mxu0 %v951_v50 }
 0x342   :  { %1127 = vmatpush.msra.mxu0 %v949_v52  ;;  %v1696_v52 = vld [vmem:[#allocation32] sm:$0xf] }
 0x344   :  { %1128 = vmatpush.msra.mxu0 %v947_v54 }
 0x346   :  { %1129 = vmatpush.msra.mxu0 %v945_v56 }
 0x348   :  { %1130 = vmatpush.msra.mxu0 %v943_v59  ;;  %v2959_v2 = vpop.f32.mrf.mxu2  ;;  %v1945_v59 = vld [vmem:[%s3042_s26 + $0x8] sm:$0x3] }
 0x349   :  { %v682_v61 = vperm.slane %v1945_v59, 1  ;;  %v1755_v59 = vld [vmem:[#allocation35 + $0x28] sm:$0xff] }
 0x34a   :  { %1131 = vmatpush.msra.mxu0 %v941_v62 }
 0x34c   :  { %1132 = vmatpush.msra.mxu0 %v939_v0 }
 0x34d   :  { %1133 = vmatmul.f32.vlgmr.msra.gmra.mxu0 %v2955_v3 }
 0x34e   :  { %1197 = vmatpush.msrb.mxu0 %v842_v4 }
 0x350   :  { %1198 = vmatpush.msrb.mxu0 %v840_v6 }
 0x352   :  { %1199 = vmatpush.msrb.mxu0 %v838_v7 }
 0x354   :  { %1200 = vmatpush.msrb.mxu0 %v836_v8 }
 0x356   :  { %1201 = vmatpush.msrb.mxu0 %v834_v9 }
 0x358   :  { %1202 = vmatpush.msrb.mxu0 %v832_v10 }
 0x35a   :  { %1203 = vmatpush.msrb.mxu0 %v830_v11 }
 0x35c   :  { %1204 = vmatpush.msrb.mxu0 %v828_v49  ;;  %v1781_v49 = vld [vmem:[#allocation35 + $0xf8] sm:$0xff] }
 0x35e   :  { %1205 = vmatpush.msrb.mxu0 %v826_v60  ;;  %v1780_v60 = vld [vmem:[#allocation35 + $0xf0] sm:$0xff] }
 0x360   :  { %1206 = vmatpush.msrb.mxu0 %v824_v12  ;;  %v1779_v12 = vld [vmem:[#allocation35 + $0xe8] sm:$0xff] }
 0x362   :  { %1207 = vmatpush.msrb.mxu0 %v822_v58  ;;  %v1778_v58 = vld [vmem:[#allocation35 + $0xe0] sm:$0xff] }
 0x364   :  { %1208 = vmatpush.msrb.mxu0 %v820_v13  ;;  %v1777_v13 = vld [vmem:[#allocation35 + $0xd8] sm:$0xff] }
 0x366   :  { %1209 = vmatpush.msrb.mxu0 %v818_v16  ;;  %v1775_v16 = vld [vmem:[#allocation35 + $0xc8] sm:$0xff] }
 0x368   :  { %v1174_v25 = vpop.f32.mrf.mxu2  ;;  %1210 = vmatpush.msrb.mxu0 %v816_v18  ;;  %v1774_v18 = vld [vmem:[#allocation35 + $0xc0] sm:$0xff] }
 0x369   :  { %v2963_v24 = vadd.f32 %v1174_v25, %v1155_v20  ;;  %v1773_v20 = vld [vmem:[#allocation35 + $0xb8] sm:$0xff]  ;;  %v1772_v25 = vld [vmem:[#allocation35 + $0xb0] sm:$0xff] }
 0x36a   :  { %1211 = vmatpush.msrb.mxu0 %v814_v23  ;;  %v1771_v23 = vld [vmem:[#allocation35 + $0xa8] sm:$0xff] }
 0x36c   :  { %1212 = vmatpush.msrb.mxu0 %v812_v26  ;;  %v1770_v26 = vld [vmem:[#allocation35 + $0xa0] sm:$0xff] }
 0x36d   :  { %1213 = vmatmul.f32.vlgmr.msrb.gmra.mxu0 %v2952_v37  ;;  %v948_v37 = vld [vmem:[#allocation25 + $0x748] sm:$0xff] }
 0x36e   :  { %1277 = vmatpush.msra.mxu0 %v970_v28  ;;  %v1769_v28 = vld [vmem:[#allocation35 + $0x98] sm:$0xff] }
 0x370   :  { %1278 = vmatpush.msra.mxu0 %v968_v30  ;;  %v2981_v30 = vpop.f32.mrf.mxu3 }
 0x372   :  { %1279 = vmatpush.msra.mxu0 %v966_v19  ;;  %v1768_v19 = vld [vmem:[#allocation35 + $0x90] sm:$0xff] }
 0x374   :  { %1280 = vmatpush.msra.mxu0 %v964_v31 }
 0x376   :  { %1281 = vmatpush.msra.mxu0 %v962_v29  ;;  %v1700_v29 = vld [vmem:[#allocation34 + $0x18] sm:$0xff] }
 0x377   :  { %1716 = vmatpush.msrb.mxu3 %v1700_v29 }
 0x378   :  { %1282 = vmatpush.msra.mxu0 %v960_v32  ;;  %v1767_v32 = vld [vmem:[#allocation35 + $0x88] sm:$0xff] }
 0x37a   :  { %1283 = vmatpush.msra.mxu0 %v958_v47  ;;  %v1699_v47 = vld [vmem:[#allocation34 + $0x10] sm:$0xff] }
 0x37b   :  { %1717 = vmatpush.msrb.mxu3 %v1699_v47 }
 0x37c   :  { %1284 = vmatpush.msra.mxu0 %v956_v33  ;;  %v1766_v33 = vld [vmem:[#allocation35 + $0x80] sm:$0xff] }
 0x37e   :  { %1285 = vmatpush.msra.mxu0 %v954_v35  ;;  %v2985_v35 = vpop.f32.mrf.mxu3 }
 0x380   :  { %1286 = vmatpush.msra.mxu0 %v952_v36  ;;  %v1698_v36 = vld [vmem:[#allocation34 + $0x8] sm:$0xff] }
 0x381   :  { %1718 = vmatpush.msrb.mxu3 %v1698_v36 }
 0x382   :  { %1287 = vmatpush.msra.mxu0 %v950_v38  ;;  %v1697_v38 = vld [vmem:[#allocation34] sm:$0xff] }
 0x383   :  { %1719 = vmatpush.msrb.mxu3 %v1697_v38 }
 0x384   :  { %1288 = vmatpush.msra.mxu0 %v948_v37  ;;  %v1765_v37 = vld [vmem:[#allocation35 + $0x78] sm:$0xff] }
 0x385   :  { %1782 = vmatpush.msra.mxu3 %v1765_v37 }
 0x386   :  { %1289 = vmatpush.msra.mxu0 %v946_v39 }
 0x388   :  { %1290 = vmatpush.msra.mxu0 %v944_v14  ;;  %v2966_v42 = vpop.f32.mrf.mxu2  ;;  %v1764_v14 = vld [vmem:[#allocation35 + $0x70] sm:$0xff] }
 0x389   :  { %1783 = vmatpush.msra.mxu3 %v1764_v14 }
 0x38a   :  { %1291 = vmatpush.msra.mxu0 %v942_v40  ;;  %v1763_v40 = vld [vmem:[#allocation35 + $0x68] sm:$0xff] }
 0x38b   :  { %1784 = vmatpush.msra.mxu3 %v1763_v40 }
 0x38c   :  { %1292 = vmatpush.msra.mxu0 %v940_v41  ;;  %v1762_v41 = vld [vmem:[#allocation35 + $0x60] sm:$0xff] }
 0x38d   :  { %1293 = vmatmul.f32.vlgmr.msra.gmra.mxu0 %v2955_v3  ;;  %1785 = vmatpush.msra.mxu3 %v1762_v41  ;;  %v1823_v41 = vperm.slane %v2939_v17, 7 }
 0x38e   :  { %1887 = vmatpush.msk.msrb.mxu0 %vm537_vm1, %v1696_v52  ;;  %v1759_v52 = vld [vmem:[#allocation35 + $0x48] sm:$0xff] }
 0x390   :  { %1802 = vmatpush.msra.mxu0 %v1781_v49 }
 0x392   :  { %1803 = vmatpush.msra.mxu0 %v1780_v60 }
 0x394   :  { %1804 = vmatpush.msra.mxu0 %v1779_v12 }
 0x396   :  { %1805 = vmatpush.msra.mxu0 %v1778_v58 }
 0x398   :  { %v1639_v46 = vpop.f32.mrf.mxu2  ;;  %1806 = vmatpush.msra.mxu0 %v1777_v13  ;;  %v1303_v13 = vpop.permute.xlu2 %1302 }
 0x399   :  { %v2970_v48 = vadd.f32 %v1639_v46, %v1618_v43  ;;  %v1761_v43 = vld [vmem:[#allocation35 + $0x58] sm:$0xff]  ;;  %v1194_v46 = vpop.f32.mrf.mxu3 }
 0x39a   :  { %1807 = vmatpush.msra.mxu0 %v1776_v27  ;;  %1786 = vmatpush.msra.mxu3 %v1761_v43 }
 0x39b   :  { %v1650_v45 = vsel %vm1649_vm0, %v2970_v48, -inf }
 0x39c   :  { %1651 = vmax.xlane.f32.xlu0 %v1650_v45  ;;  %v1678_v50 = vrot.slane %v1650_v45, 4  ;;  %1808 = vmatpush.msra.mxu0 %v1775_v16 }
 0x39e   :  { %v1679_v51 = vmax.f32 %v1650_v45, %v1678_v50  ;;  %1809 = vmatpush.msra.mxu0 %v1774_v18  ;;  %v1760_v50 = vld [vmem:[#allocation35 + $0x50] sm:$0xff]  ;;  %v1315_v18 = vperm.slane %v2939_v17, 5 }
 0x39f   :  { %1787 = vmatpush.msra.mxu3 %v1760_v50 }
 0x3a0   :  { %v1680_v53 = vrot.slane %v1679_v51, 2  ;;  %1810 = vmatpush.msra.mxu0 %v1773_v20 }
 0x3a1   :  { %1788 = vmatpush.msra.mxu3 %v1759_v52 }
 0x3a2   :  { %v1681_v54 = vmax.f32 %v1679_v51, %v1680_v53  ;;  %1811 = vmatpush.msra.mxu0 %v1772_v25  ;;  %v1195_v51 = vadd.f32 %v1194_v46, %v2963_v24 }
 0x3a4   :  { %v1682_v55 = vrot.slane %v1681_v54, 1  ;;  %1812 = vmatpush.msra.mxu0 %v1771_v23 }
 0x3a6   :  { %v1683_v56 = vmax.f32 %v1681_v54, %v1682_v55  ;;  %1813 = vmatpush.msra.mxu0 %v1770_v26  ;;  %v1758_v54 = vld [vmem:[#allocation35 + $0x40] sm:$0xff]  ;;  %v1757_v55 = vld [vmem:[#allocation35 + $0x38] sm:$0xff] }
 0x3a7   :  { %1789 = vmatpush.msra.mxu3 %v1758_v54 }
 0x3a8   :  { %v1684_v57 = vsub.f32 %v2970_v48, %v1683_v56  ;;  %1814 = vmatpush.msra.mxu0 %v1769_v28 }
 0x3a9   :  { %1790 = vmatpush.msra.mxu3 %v1757_v55 }
 0x3aa   :  { %v1685_v62 = vmul.f32 1.442695, %v1684_v57  ;;  %v704_v63 = vpop.f32.mrf.mxu0  ;;  %1815 = vmatpush.msra.mxu0 %v1768_v19  ;;  %v1756_v57 = vld [vmem:[#allocation35 + $0x30] sm:$0xff] }
 0x3ab   :  { %v705_v0 = vadd.f32 %v704_v63, %v682_v61  ;;  %1791 = vmatpush.msra.mxu3 %v1756_v57  ;;  %v1274_v63 = vpop.f32.mrf.mxu3 }
 0x3ac   :  { %1936 = vpow2.f32 %v1685_v62  ;;  %1816 = vmatpush.msra.mxu0 %v1767_v32  ;;  %v1754_v62 = vld [vmem:[#allocation35 + $0x20] sm:$0xff] }
 0x3ad   :  { %1309 = vperm.xlu1 %1932, %v705_v0   ;;  %1792 = vmatpush.msra.mxu3 %v1755_v59  ;;  %v1753_v0 = vld [vmem:[#allocation35 + $0x18] sm:$0xff] }
 0x3ae   :  { %1817 = vmatpush.msra.mxu0 %v1766_v33 }
 0x3af   :  { %1793 = vmatpush.msra.mxu3 %v1754_v62 }
 0x3b1   :  { %1794 = vmatpush.msra.mxu3 %v1753_v0 }
 0x3b2   :  { %v1937_v1 = vpop.eup %1936  ;;  %v2983_v31 = vpop.f32.mrf.mxu0 }
 0x3b3   :  { %v1687_v3 = vsel %vm1649_vm0, %v1937_v1, 0.0 }
 0x3b4   :  { %v1688_v4 = vrot.slane %v1687_v3, 4 }
 0x3b6   :  { %v1689_v5 = vadd.f32 %v1688_v4, %v1687_v3 }
 0x3b8   :  { %v1690_v6 = vrot.slane %v1689_v5, 2 }
 0x3ba   :  { %v1691_v7 = vadd.f32 %v1690_v6, %v1689_v5  ;;  %v1751_v5 = vld [vmem:[#allocation35 + $0x8] sm:$0xff] }
 0x3bc   :  { %v1692_v8 = vrot.slane %v1691_v7, 1 }
 0x3be   :  { %v1693_v9 = vadd.f32 %v1692_v8, %v1691_v7  ;;  %v1750_v8 = vld [vmem:[#allocation35] sm:$0xff] }
 0x3c0   :  { %1938 = vrcp.f32 %v1693_v9 }
 0x3c6   :  { %v1939_v10 = vpop.eup %1938 }
 0x3c7   :  { %v1695_v11 = vmul.f32 %v1939_v10, %v1937_v1  ;;  %v1752_v1 = vld [vmem:[#allocation35 + $0x10] sm:$0xff]  ;;  %v1035_v10 = vadd.f32 %v2981_v30, %v2950_v34  ;;  %v1642_v30 = vld [vmem:[%s3074_s16] sm:$0xff] }
 0x3c8   :  { %1795 = vmatpush.msra.mxu3 %v1752_v1 }
 0x3c9   :  { %1888 = vmatmul.msk.f32.vlgmr.msrb.gmra.mxu0 %vm1649_vm0, %v1695_v11  ;;  %v1299_v11 = vld [vmem:[#allocation26] sm:$0x3]  ;;  %v1055_v60 = vadd.f32 %v2983_v31, %v1035_v10 }
 0x3ca   :  { %v2987_v39 = vpop.f32.mrf.mxu0  ;;  %1796 = vmatpush.msra.mxu3 %v1751_v5  ;;  %v1305_v12 = vperm.slane %v1299_v11, 0  ;;  %v1312_v58 = vperm.slane %v1299_v11, 1 }
 0x3cc   :  { %1797 = vmatpush.msra.mxu3 %v1750_v8  ;;  %v1306_v16 = vmul.f32 %v1305_v12, %v1303_v13 }
 0x3ea   :  { %v1214_v45 = vpop.f32.mrf.mxu0 }
 0x3eb   :  { %v1215_v53 = vadd.f32 %v1214_v45, %v1195_v51 }
 0x3ed   :  { %v1235_v56 = vadd.f32 %v2932_v44, %v1215_v53 }
 0x3ef   :  { %v1255_v61 = vadd.f32 %v2966_v42, %v1235_v56 }
 0x3f1   :  { %v1275_v24 = vadd.f32 %v1274_v63, %v1255_v61 }
 0x40a   :  { %v1294_v3 = vpop.f32.mrf.mxu0 }
 0x40b   :  { %v1295_v4 = vadd.f32 %v1294_v3, %v1275_v24 }
 0x40d   :  { %v1298_v6 = vmax.f32 %v1295_v4, 0.0 }
 0x40f   :  { %v1652_v44 = vpop.xlane.xlu0 %1651  ;;  %1818 = vmatmul.f32.vlgmr.msra.gmra.mxu0 %v1298_v6 }
 0x410   :  { %v1653_v7 = vsub.f32 %v2970_v48, %v1652_v44  ;;  %v1075_v48 = vadd.f32 %v2928_v21, %v1055_v60 }
 0x412   :  { %v1654_v42 = vmul.f32 1.442695, %v1653_v7  ;;  %v1095_v25 = vadd.f32 %v2959_v2, %v1075_v48 }
 0x414   :  { %1940 = vpow2.f32 %v1654_v42  ;;  %v1115_v26 = vadd.f32 %v2985_v35, %v1095_v25 }
 0x416   :  { %v1135_v28 = vadd.f32 %v2987_v39, %v1115_v26 }
 0x418   :  { %v1297_v21 = vmax.f32 %v1135_v28, 0.0 }
 0x41a   :  { %v1941_v9 = vpop.eup %1940 }
 0x41b   :  { %v1656_v49 = vsel %vm1649_vm0, %v1941_v9, 0.0 }
 0x41c   :  { %1657 = vadd.xlane.f32.xlu0 %v1656_v49 }
 0x41f   :  { %v1310_v27 = vpop.permute.xlu1 %1309 }
 0x420   :  { %v1313_v20 = vmul.f32 %v1312_v58, %v1310_v27 }
 0x422   :  { %v1314_v23 = vadd.f32 %v1313_v20, %v1306_v16 }
 0x424   :  { %v1316_v34 = vadd.f32 %v1315_v18, %v1314_v23 }
 0x426   :  { %1886 = vmatmul.msk.f32.vlgmr.msrb.gmra.mxu3 %vm655_vm2, %v1316_v34 }
 0x42e   :  { %1798 = vmatmul.f32.vlgmr.msra.gmra.mxu3 %v1297_v21 }
 0x430   :  { %1644 = vperm.xlu0 %1933, %v1642_v30  }
 0x446   :  { %v1747_v36 = vpop.f32.mrf.mxu0 }
 0x48c   :  { %v1819_v37 = vpop.f32.mrf.mxu0 }
 0x48f   :  { %v1658_v19 = vpop.xlane.xlu0 %1657 }
 0x490   :  { %1942 = vlog2.f32 %v1658_v19 }
 0x496   :  { %v1943_v31 = vpop.eup %1942 }
 0x497   :  { %v1660_v29 = vmul.f32 0.6931472, %v1943_v31 }
 0x499   :  { %v1661_v32 = vsub.f32 %v1653_v7, %v1660_v29 }
 0x4a2   :  { %v1645_v2 = vpop.permute.xlu0 %1644 }
 0x4a3   :  { %vm1646_vm1 = vcmp.eq.s32.totalorder %v1645_v2, %v2860_v15 }
 0x4a4   :  { %v1885_v47 = vsel %vm1646_vm1, 1.0, %v2551_v22 }
 0x4a5   :  { %v1662_v33 = vmul.f32 %v1885_v47, %v1661_v32 }
 0x4a7   :  { %v1663_v35 = vsel %vm1649_vm0, %v1662_v33, 0.0 }
 0x4a8   :  { %1664 = vadd.xlane.f32.xlu2 %v1663_v35 }
 0x4a9   :  { %v1721_v38 = vpop.f32.mrf.mxu3 }
 0x4aa   :  { %v1748_v14 = vadd.f32 %v1747_v36, %v1721_v38 }
 0x4b1   :  { %v1799_v39 = vpop.f32.mrf.mxu3 }
 0x4b2   :  { %v1820_v40 = vadd.f32 %v1819_v37, %v1799_v39 }
 0x4b4   :  { %v1822_v43 = vadd.f32 %v1820_v40, %v1748_v14 }
 0x4b6   :  { %v1824_v46 = vadd.f32 %v1823_v41, %v1822_v43 }
 0x4b8   :  { %1826 = vst.msk [vmem:[%s3075_s7] sm:$0xff] %vm1825_vm5, %v1824_v46 }
 0x51b   :  { %v1665_v15 = vpop.xlane.xlu2 %1664 }
 0x51c   :  { %v1666_v22 = vrot.slane %v1665_v15, 4 }
 0x51e   :  { %v1667_v45 = vadd.f32 %v1666_v22, %v1665_v15 }
 0x520   :  { %v1668_v50 = vrot.slane %v1667_v45, 2 }
 0x522   :  { %v1669_v51 = vadd.f32 %v1668_v50, %v1667_v45 }
 0x524   :  { %v1670_v52 = vrot.slane %v1669_v51, 1 }
 0x526   :  { %v1671_v53 = vadd.f32 %v1670_v52, %v1669_v51 }
 0x528   :  { %1889 = vpush %v1671_v53 }
 0x559   :  { %s1890_s28 = spop %1889 }
 0x55a   :  { %s1673_s22 = ssub.f32 0.0, %s1890_s28 }
 0x55c   :  { %s1674_s25 = smul.f32 0.125, %s1673_s22 }
 0x55e   :  { %v1675_v17 = vstv %s1674_s25 }
 0x55f   :  { %1677 = vst.msk [vmem:[#allocation37] sm:$0x1] %vm1676_vm3, %v1675_v17 }
 0x560   :  { %1837 = dma.vmem_to_hbm [thread:$0]  %s1833_s27, 16, %s1835_s24, [#allocation4]  }
 0x561   :  { %2522 = dma.done.wait [#allocation4], 16  }
 0x562   :  { %2523 = vsyncadd [#allocation4], 4294967280 }
 0x563   :  { %1846 = vsyncpa [#allocation3], 1 }
 0x564   :  { %1847 = vsyncpa [#allocation6], 1 }
 0x565   :  { %1848 = vsyncpa [#allocation9], 1 }
 0x566   :  { %1849 = vsyncpa [#allocation12], 1 }
 0x567   :  { %1850 = vsyncpa [#allocation15], 1 }
 0x568   :  { %1851 = vsyncpa [#allocation18], 1 }
 0x569   :  { %1852 = vsyncpa [#allocation21], 1 }
 0x56a   :  { %1853 = vsyncpa [#allocation24], 1 }
 0x56b   :  { %1854 = vsyncpa [#allocation27], 1 }
 0x56c   :  { %1855 = vsyncpa [#allocation30], 1 }
 0x56d   :  { %1856 = vsyncpa [#allocation33], 1 }
 0x56e   :  { %1857 = vsyncpa [#allocation36], 1 }
 0x56f   :  { %1858 = vsyncpa [#allocation4], 1 }

</bundles_post_ra>
